<compile_context>
chip_gen: v6e
topology: v6e:2x2x1
jax: 0.10.0
libtpu: 0.0.40
codegen_flags: <defaults>
</compile_context>

<pallas_src>
import jax
import jax.numpy as jnp
from jax import lax
from jax.experimental import pallas as pl
from jax.experimental.pallas import tpu as pltpu

K1, P1 = 500, 250
K2, P2 = 200, 100
K3, P3 = 15, 6
BN_EPS = 1e-5

# MXU operand dtype for the conv matmuls (see header note).
CONV_MATMUL_DTYPE = jnp.float32


# ----------------------------- kernel side ---------------------------------


def _bn_train_flat(y, gamma, shift_f, sel, expand, c):
    """Training-mode BatchNorm1d on a flat (N, L_out*C) activation.

    Lane index is l*C + ch.  Per-channel stats over (N, L_out), biased
    variance, two-pass (mean first, then var of centred values).
    gamma:   (1, C)        per-channel scale
    shift_f: (1, L_out*C)  beta already expanded to the flat layout
    sel:     (L_out*C, C)  channel-reduction selector (sel[l*C+ci, ci] = 1)
    expand:  (C, L_out*C)  channel -> flat-lane broadcast (sel transposed)
    """
    n, lc = y.shape
    inv_cnt = 1.0 / float(n * (lc // c))
    col = jnp.sum(y, axis=0, keepdims=True)                                  # (1, L*C)
    mean_c = jnp.dot(col, sel, preferred_element_type=jnp.float32) * inv_cnt  # (1, C)
    mean_f = jnp.dot(mean_c, expand, preferred_element_type=jnp.float32)      # (1, L*C)
    d = y - mean_f
    ss = jnp.sum(d * d, axis=0, keepdims=True)                               # (1, L*C)
    var_c = jnp.dot(ss, sel, preferred_element_type=jnp.float32) * inv_cnt    # (1, C)
    scale_c = gamma * lax.rsqrt(var_c + BN_EPS)                              # (1, C)
    scale_f = jnp.dot(scale_c, expand, preferred_element_type=jnp.float32)    # (1, L*C)
    return d * scale_f + shift_f


def _conv_bn(y_in, w_ref, b_ref, g_ref, bt_ref, sel_ref, exp_ref, c):
    """One Conv1d (single matmul vs. banded weight matrix) + BatchNorm."""
    y = jnp.dot(y_in.astype(w_ref.dtype), w_ref[...],
                preferred_element_type=jnp.float32) + b_ref[...]
    lc = y.shape[1]                       # L_out * C (260 / 264 / 256 at demo shapes)
    sel = sel_ref[:lc, :]                 # static partial load of the shared selector
    expand = exp_ref[:, :lc]
    return _bn_train_flat(y, g_ref[...], bt_ref[...], sel, expand, c)


def residual_kernel(x_ref,
                    w1_ref, b1_ref, g1_ref, bt1_ref,
                    w2_ref, b2_ref, g2_ref, bt2_ref,
                    w3_ref, b3_ref, g3_ref, bt3_ref,
                    sel_ref, exp_ref,
                    o_ref):
    c = g1_ref.shape[1]
    x = x_ref[...]                                                  # (N, L*C), lane-dense
    y1 = jnp.maximum(
        _conv_bn(x,  w1_ref, b1_ref, g1_ref, bt1_ref, sel_ref, exp_ref, c), 0.0)
    y2 = jnp.maximum(
        _conv_bn(y1, w2_ref, b2_ref, g2_ref, bt2_ref, sel_ref, exp_ref, c), 0.0)
    y3 = _conv_bn(y2, w3_ref, b3_ref, g3_ref, bt3_ref, sel_ref, exp_ref, c)
    o_ref[...] = jnp.maximum(y3 + x, 0.0)                           # identity shortcut + ReLU


# ----------------------------- wrapper side ---------------------------------


def _conv_weight_matrix(w, l_in, pad):
    """PyTorch Conv1d weight (Cout, Cin, K) -> dense (L_in*Cin, L_out*Cout).

    out_flat = x_flat @ Wmat reproduces conv1d(x, w, padding=pad, stride=1):
        Wmat[q*Cin+ci, lo*Cout+co] = w[co, ci, q + pad - lo]  if 0 <= tap < K else 0
    Rows corresponding to the zero padding are omitted entirely (they would
    only multiply zeros), so no padded activation is ever materialised.
    """
    c_out, c_in, k = w.shape
    l_out = l_in + 2 * pad - k + 1
    q = jnp.arange(l_in)[:, None]              # input position
    lo = jnp.arange(l_out)[None, :]            # output position
    tap = q + pad - lo                         # (l_in, l_out)
    valid = (tap >= 0) & (tap < k)
    w_g = jnp.take(w, jnp.clip(tap, 0, k - 1), axis=2)      # (Cout, Cin, l_in, l_out)
    w_g = jnp.where(valid[None, None], w_g, 0.0)
    return jnp.transpose(w_g, (2, 1, 3, 0)).reshape(l_in * c_in, l_out * c_out)


def residual_forward(x, params):
    """x: (N, C_in, L) float32 in PyTorch NCL layout. Returns (N, C_out, L)."""
    n, c_in, l = x.shape
    c = params["w1"].shape[0]
    assert c_in == c, "use_1x1conv=False path requires in_channels == out_channels"

    l1, l2 = l + 1, l + 2
    # Flat NLC layout: lane index = position*C + channel.
    x_flat = jnp.transpose(x, (0, 2, 1)).reshape(n, l * c)

    mm = CONV_MATMUL_DTYPE
    w1m = _conv_weight_matrix(params["w1"], l,  P1).astype(mm)     # (l*c,  l1*c)
    w2m = _conv_weight_matrix(params["w2"], l1, P2).astype(mm)     # (l1*c, l2*c)
    w3m = _conv_weight_matrix(params["w3"], l2, P3).astype(mm)     # (l2*c, l*c)

    def flat_per_channel(v, lo):   # (C,) -> (1, lo*C) with index lo*C+co -> v[co]
        return jnp.tile(v, lo).reshape(1, lo * c)

    def chan(v):                   # (C,) -> (1, C)
        return v.reshape(1, c)

    lmax = l2
    sel = jnp.tile(jnp.eye(c, dtype=jnp.float32), (lmax, 1))       # (lmax*c, c)
    expand = sel.T                                                 # (c, lmax*c)

    inputs = (
        x_flat,
        w1m, flat_per_channel(params["b1"], l1), chan(params["g1"]),
        flat_per_channel(params["beta1"], l1),
        w2m, flat_per_channel(params["b2"], l2), chan(params["g2"]),
        flat_per_channel(params["beta2"], l2),
        w3m, flat_per_channel(params["b3"], l),  chan(params["g3"]),
        flat_per_channel(params["beta3"], l),
        sel, expand,
    )

    # Single grid point: total footprint ~1 MiB, so whole-array VMEM blocks and
    # the default scoped-VMEM limit are fine on v5e/v6e/v7x.
    out_flat = pl.pallas_call(
        residual_kernel,
        out_shape=jax.ShapeDtypeStruct((n, l * c), jnp.float32),
        in_specs=[pl.BlockSpec(memory_space=pltpu.MemorySpace.VMEM)] * len(inputs),
        out_specs=pl.BlockSpec(memory_space=pltpu.MemorySpace.VMEM),
    )(*inputs)

    return jnp.transpose(out_flat.reshape(n, l, c), (0, 2, 1))     # back to NCL


# ----------------------------- reference & init -----------------------------


def residual_reference(x, params):
    """Pure-JAX reference: lax.conv + training-mode (biased-var) BatchNorm1d."""
    def conv(h, w, b, pad):
        y = lax.conv_general_dilated(
            h, w, window_strides=(1,), padding=[(pad, pad)],
            dimension_numbers=("NCH", "OIH", "NCH"),
            precision=lax.Precision.HIGHEST)
        return y + b[None, :, None]

    def bn(y, gamma, beta):
        mean = jnp.mean(y, axis=(0, 2), keepdims=True)
        var = jnp.mean(jnp.square(y - mean), axis=(0, 2), keepdims=True)
        return (gamma[None, :, None] * (y - mean) * lax.rsqrt(var + BN_EPS)
                + beta[None, :, None])

    y1 = jax.nn.relu(bn(conv(x, params["w1"], params["b1"], P1),
                        params["g1"], params["beta1"]))
    y2 = jax.nn.relu(bn(conv(y1, params["w2"], params["b2"], P2),
                        params["g2"], params["beta2"]))
    y3 = bn(conv(y2, params["w3"], params["b3"], P3),
            params["g3"], params["beta3"])
    return jax.nn.relu(y3 + x)


def init_params(key, c_in, c_out):
    """Deterministic PyTorch-style init (uniform +-1/sqrt(fan_in); BN gamma=1, beta=0)."""
    ks = jax.random.split(key, 6)

    def conv_init(kw, kb, shape):
        fan_in = shape[1] * shape[2]
        bound = 1.0 / (fan_in ** 0.5)
        w = jax.random.uniform(kw, shape, jnp.float32, -bound, bound)
        b = jax.random.uniform(kb, (shape[0],), jnp.float32, -bound, bound)
        return w, b

    w1, b1 = conv_init(ks[0], ks[1], (c_out, c_in, K1))
    w2, b2 = conv_init(ks[2], ks[3], (c_out, c_out, K2))
    w3, b3 = conv_init(ks[4], ks[5], (c_out, c_out, K3))
    ones = jnp.ones((c_out,), jnp.float32)
    zeros = jnp.zeros((c_out,), jnp.float32)
    return dict(w1=w1, b1=b1, w2=w2, b2=b2, w3=w3, b3=b3,
                g1=ones, beta1=zeros, g2=ones, beta2=zeros, g3=ones, beta3=zeros)


if __name__ == "__main__":
    key = jax.random.PRNGKey(0)
    kx, kp = jax.random.split(key)

    N, C, L = 2, 4, 64            # batch, channels (in == out), sequence length
    x = jax.random.normal(kx, (N, C, L), jnp.float32)
    params = init_params(kp, C, C)

    out = jax.block_until_ready(residual_forward(x, params))

    assert out.shape == (N, C, L)
    assert bool(jnp.all(jnp.isfinite(out)))
    assert bool(jnp.all(out >= 0.0))   # final ReLU

    # Tolerance check against an independent pure-JAX implementation
    # (loose enough to absorb matmul-precision-mode differences, tight enough
    # to catch any structural / indexing / BN-stat bug, which show up as O(0.1+)).
    ref = jax.block_until_ready(residual_reference(x, params))
    max_err = float(jnp.max(jnp.abs(out - ref)))
    assert max_err < 5e-2, f"kernel deviates from pure-JAX reference: max_err={max_err}"

    print("KERNEL_OK")
</pallas_src>

<mosaic_0001>
module attributes {stable_mosaic.version = 11 : i64} {
  func.func @residual_kernel(%arg0: memref<2x256xf32, #tpu.memory_space<vmem>>, %arg1: memref<256x260xf32, #tpu.memory_space<vmem>>, %arg2: memref<1x260xf32, #tpu.memory_space<vmem>>, %arg3: memref<1x4xf32, #tpu.memory_space<vmem>>, %arg4: memref<1x260xf32, #tpu.memory_space<vmem>>, %arg5: memref<260x264xf32, #tpu.memory_space<vmem>>, %arg6: memref<1x264xf32, #tpu.memory_space<vmem>>, %arg7: memref<1x4xf32, #tpu.memory_space<vmem>>, %arg8: memref<1x264xf32, #tpu.memory_space<vmem>>, %arg9: memref<264x256xf32, #tpu.memory_space<vmem>>, %arg10: memref<1x256xf32, #tpu.memory_space<vmem>>, %arg11: memref<1x4xf32, #tpu.memory_space<vmem>>, %arg12: memref<1x256xf32, #tpu.memory_space<vmem>>, %arg13: memref<264x4xf32, #tpu.memory_space<vmem>>, %arg14: memref<4x264xf32, #tpu.memory_space<vmem>>, %arg15: memref<2x256xf32, #tpu.memory_space<vmem>>) attributes {dimension_semantics = [], scalar_prefetch = 0 : i64, scratch_operands = 0 : i64, tpu.core_type = #tpu.core_type<tc>} {
    %c0 = arith.constant 0 : index
    %c0_0 = arith.constant 0 : index
    %0 = vector.load %arg0[%c0, %c0_0] : memref<2x256xf32, #tpu.memory_space<vmem>>, vector<2x256xf32>
    %c0_1 = arith.constant 0 : index
    %c0_2 = arith.constant 0 : index
    %1 = vector.load %arg1[%c0_1, %c0_2] : memref<256x260xf32, #tpu.memory_space<vmem>>, vector<256x260xf32>
    %cst = arith.constant dense<0.000000e+00> : vector<2x260xf32>
    %2 = tpu.matmul %0, %1, %cst {dimension_numbers = #tpu.dot_dimension_numbers<[1], [0], [0], [1], [0, 0, 1, 1], [], []>} : vector<2x256xf32>, vector<256x260xf32>, vector<2x260xf32> -> vector<2x260xf32>
    %c0_3 = arith.constant 0 : index
    %c0_4 = arith.constant 0 : index
    %3 = vector.load %arg2[%c0_3, %c0_4] : memref<1x260xf32, #tpu.memory_space<vmem>>, vector<1x260xf32>
    %4 = vector.broadcast %3 : vector<1x260xf32> to vector<2x260xf32>
    %5 = arith.addf %2, %4 : vector<2x260xf32>
    %c0_5 = arith.constant 0 : index
    %c0_6 = arith.constant 0 : index
    %6 = vector.load %arg13[%c0_5, %c0_6] : memref<264x4xf32, #tpu.memory_space<vmem>>, vector<260x4xf32>
    %c0_7 = arith.constant 0 : index
    %c0_8 = arith.constant 0 : index
    %7 = vector.load %arg14[%c0_7, %c0_8] : memref<4x264xf32, #tpu.memory_space<vmem>>, vector<4x260xf32>
    %c0_9 = arith.constant 0 : index
    %c0_10 = arith.constant 0 : index
    %8 = vector.load %arg3[%c0_9, %c0_10] : memref<1x4xf32, #tpu.memory_space<vmem>>, vector<1x4xf32>
    %c0_11 = arith.constant 0 : index
    %c0_12 = arith.constant 0 : index
    %9 = vector.load %arg4[%c0_11, %c0_12] : memref<1x260xf32, #tpu.memory_space<vmem>>, vector<1x260xf32>
    %cst_13 = arith.constant dense<0.000000e+00> : vector<260xf32>
    %10 = vector.multi_reduction <add>, %5, %cst_13 [0] : vector<2x260xf32> to vector<260xf32>
    %11 = vector.shape_cast %10 : vector<260xf32> to vector<1x260xf32>
    %cst_14 = arith.constant dense<0.000000e+00> : vector<1x4xf32>
    %12 = tpu.matmul %11, %6, %cst_14 {dimension_numbers = #tpu.dot_dimension_numbers<[1], [0], [0], [1], [0, 0, 1, 1], [], []>} : vector<1x260xf32>, vector<260x4xf32>, vector<1x4xf32> -> vector<1x4xf32>
    %cst_15 = arith.constant 0.0076923077 : f32
    %13 = vector.broadcast %cst_15 : f32 to vector<1x4xf32>
    %14 = arith.mulf %12, %13 : vector<1x4xf32>
    %cst_16 = arith.constant dense<0.000000e+00> : vector<1x260xf32>
    %15 = tpu.matmul %14, %7, %cst_16 {dimension_numbers = #tpu.dot_dimension_numbers<[1], [0], [0], [1], [0, 0, 1, 1], [], []>} : vector<1x4xf32>, vector<4x260xf32>, vector<1x260xf32> -> vector<1x260xf32>
    %16 = vector.broadcast %15 : vector<1x260xf32> to vector<2x260xf32>
    %17 = arith.subf %5, %16 : vector<2x260xf32>
    %18 = arith.mulf %17, %17 : vector<2x260xf32>
    %cst_17 = arith.constant dense<0.000000e+00> : vector<260xf32>
    %19 = vector.multi_reduction <add>, %18, %cst_17 [0] : vector<2x260xf32> to vector<260xf32>
    %20 = vector.shape_cast %19 : vector<260xf32> to vector<1x260xf32>
    %cst_18 = arith.constant dense<0.000000e+00> : vector<1x4xf32>
    %21 = tpu.matmul %20, %6, %cst_18 {dimension_numbers = #tpu.dot_dimension_numbers<[1], [0], [0], [1], [0, 0, 1, 1], [], []>} : vector<1x260xf32>, vector<260x4xf32>, vector<1x4xf32> -> vector<1x4xf32>
    %cst_19 = arith.constant 0.0076923077 : f32
    %22 = vector.broadcast %cst_19 : f32 to vector<1x4xf32>
    %23 = arith.mulf %21, %22 : vector<1x4xf32>
    %cst_20 = arith.constant 9.99999974E-6 : f32
    %24 = vector.broadcast %cst_20 : f32 to vector<1x4xf32>
    %25 = arith.addf %23, %24 : vector<1x4xf32>
    %26 = math.rsqrt %25 : vector<1x4xf32>
    %27 = arith.mulf %8, %26 : vector<1x4xf32>
    %cst_21 = arith.constant dense<0.000000e+00> : vector<1x260xf32>
    %28 = tpu.matmul %27, %7, %cst_21 {dimension_numbers = #tpu.dot_dimension_numbers<[1], [0], [0], [1], [0, 0, 1, 1], [], []>} : vector<1x4xf32>, vector<4x260xf32>, vector<1x260xf32> -> vector<1x260xf32>
    %29 = vector.broadcast %28 : vector<1x260xf32> to vector<2x260xf32>
    %30 = arith.mulf %17, %29 : vector<2x260xf32>
    %31 = vector.broadcast %9 : vector<1x260xf32> to vector<2x260xf32>
    %32 = arith.addf %30, %31 : vector<2x260xf32>
    %cst_22 = arith.constant 0.000000e+00 : f32
    %33 = vector.broadcast %cst_22 : f32 to vector<2x260xf32>
    %34 = arith.maximumf %32, %33 : vector<2x260xf32>
    %c0_23 = arith.constant 0 : index
    %c0_24 = arith.constant 0 : index
    %35 = vector.load %arg5[%c0_23, %c0_24] : memref<260x264xf32, #tpu.memory_space<vmem>>, vector<260x264xf32>
    %cst_25 = arith.constant dense<0.000000e+00> : vector<2x264xf32>
    %36 = tpu.matmul %34, %35, %cst_25 {dimension_numbers = #tpu.dot_dimension_numbers<[1], [0], [0], [1], [0, 0, 1, 1], [], []>} : vector<2x260xf32>, vector<260x264xf32>, vector<2x264xf32> -> vector<2x264xf32>
    %c0_26 = arith.constant 0 : index
    %c0_27 = arith.constant 0 : index
    %37 = vector.load %arg6[%c0_26, %c0_27] : memref<1x264xf32, #tpu.memory_space<vmem>>, vector<1x264xf32>
    %38 = vector.broadcast %37 : vector<1x264xf32> to vector<2x264xf32>
    %39 = arith.addf %36, %38 : vector<2x264xf32>
    %c0_28 = arith.constant 0 : index
    %c0_29 = arith.constant 0 : index
    %40 = vector.load %arg13[%c0_28, %c0_29] : memref<264x4xf32, #tpu.memory_space<vmem>>, vector<264x4xf32>
    %c0_30 = arith.constant 0 : index
    %c0_31 = arith.constant 0 : index
    %41 = vector.load %arg14[%c0_30, %c0_31] : memref<4x264xf32, #tpu.memory_space<vmem>>, vector<4x264xf32>
    %c0_32 = arith.constant 0 : index
    %c0_33 = arith.constant 0 : index
    %42 = vector.load %arg7[%c0_32, %c0_33] : memref<1x4xf32, #tpu.memory_space<vmem>>, vector<1x4xf32>
    %c0_34 = arith.constant 0 : index
    %c0_35 = arith.constant 0 : index
    %43 = vector.load %arg8[%c0_34, %c0_35] : memref<1x264xf32, #tpu.memory_space<vmem>>, vector<1x264xf32>
    %cst_36 = arith.constant dense<0.000000e+00> : vector<264xf32>
    %44 = vector.multi_reduction <add>, %39, %cst_36 [0] : vector<2x264xf32> to vector<264xf32>
    %45 = vector.shape_cast %44 : vector<264xf32> to vector<1x264xf32>
    %cst_37 = arith.constant dense<0.000000e+00> : vector<1x4xf32>
    %46 = tpu.matmul %45, %40, %cst_37 {dimension_numbers = #tpu.dot_dimension_numbers<[1], [0], [0], [1], [0, 0, 1, 1], [], []>} : vector<1x264xf32>, vector<264x4xf32>, vector<1x4xf32> -> vector<1x4xf32>
    %cst_38 = arith.constant 0.0075757578 : f32
    %47 = vector.broadcast %cst_38 : f32 to vector<1x4xf32>
    %48 = arith.mulf %46, %47 : vector<1x4xf32>
    %cst_39 = arith.constant dense<0.000000e+00> : vector<1x264xf32>
    %49 = tpu.matmul %48, %41, %cst_39 {dimension_numbers = #tpu.dot_dimension_numbers<[1], [0], [0], [1], [0, 0, 1, 1], [], []>} : vector<1x4xf32>, vector<4x264xf32>, vector<1x264xf32> -> vector<1x264xf32>
    %50 = vector.broadcast %49 : vector<1x264xf32> to vector<2x264xf32>
    %51 = arith.subf %39, %50 : vector<2x264xf32>
    %52 = arith.mulf %51, %51 : vector<2x264xf32>
    %cst_40 = arith.constant dense<0.000000e+00> : vector<264xf32>
    %53 = vector.multi_reduction <add>, %52, %cst_40 [0] : vector<2x264xf32> to vector<264xf32>
    %54 = vector.shape_cast %53 : vector<264xf32> to vector<1x264xf32>
    %cst_41 = arith.constant dense<0.000000e+00> : vector<1x4xf32>
    %55 = tpu.matmul %54, %40, %cst_41 {dimension_numbers = #tpu.dot_dimension_numbers<[1], [0], [0], [1], [0, 0, 1, 1], [], []>} : vector<1x264xf32>, vector<264x4xf32>, vector<1x4xf32> -> vector<1x4xf32>
    %cst_42 = arith.constant 0.0075757578 : f32
    %56 = vector.broadcast %cst_42 : f32 to vector<1x4xf32>
    %57 = arith.mulf %55, %56 : vector<1x4xf32>
    %cst_43 = arith.constant 9.99999974E-6 : f32
    %58 = vector.broadcast %cst_43 : f32 to vector<1x4xf32>
    %59 = arith.addf %57, %58 : vector<1x4xf32>
    %60 = math.rsqrt %59 : vector<1x4xf32>
    %61 = arith.mulf %42, %60 : vector<1x4xf32>
    %cst_44 = arith.constant dense<0.000000e+00> : vector<1x264xf32>
    %62 = tpu.matmul %61, %41, %cst_44 {dimension_numbers = #tpu.dot_dimension_numbers<[1], [0], [0], [1], [0, 0, 1, 1], [], []>} : vector<1x4xf32>, vector<4x264xf32>, vector<1x264xf32> -> vector<1x264xf32>
    %63 = vector.broadcast %62 : vector<1x264xf32> to vector<2x264xf32>
    %64 = arith.mulf %51, %63 : vector<2x264xf32>
    %65 = vector.broadcast %43 : vector<1x264xf32> to vector<2x264xf32>
    %66 = arith.addf %64, %65 : vector<2x264xf32>
    %cst_45 = arith.constant 0.000000e+00 : f32
    %67 = vector.broadcast %cst_45 : f32 to vector<2x264xf32>
    %68 = arith.maximumf %66, %67 : vector<2x264xf32>
    %c0_46 = arith.constant 0 : index
    %c0_47 = arith.constant 0 : index
    %69 = vector.load %arg9[%c0_46, %c0_47] : memref<264x256xf32, #tpu.memory_space<vmem>>, vector<264x256xf32>
    %cst_48 = arith.constant dense<0.000000e+00> : vector<2x256xf32>
    %70 = tpu.matmul %68, %69, %cst_48 {dimension_numbers = #tpu.dot_dimension_numbers<[1], [0], [0], [1], [0, 0, 1, 1], [], []>} : vector<2x264xf32>, vector<264x256xf32>, vector<2x256xf32> -> vector<2x256xf32>
    %c0_49 = arith.constant 0 : index
    %c0_50 = arith.constant 0 : index
    %71 = vector.load %arg10[%c0_49, %c0_50] : memref<1x256xf32, #tpu.memory_space<vmem>>, vector<1x256xf32>
    %72 = vector.broadcast %71 : vector<1x256xf32> to vector<2x256xf32>
    %73 = arith.addf %70, %72 : vector<2x256xf32>
    %c0_51 = arith.constant 0 : index
    %c0_52 = arith.constant 0 : index
    %74 = vector.load %arg13[%c0_51, %c0_52] : memref<264x4xf32, #tpu.memory_space<vmem>>, vector<256x4xf32>
    %c0_53 = arith.constant 0 : index
    %c0_54 = arith.constant 0 : index
    %75 = vector.load %arg14[%c0_53, %c0_54] : memref<4x264xf32, #tpu.memory_space<vmem>>, vector<4x256xf32>
    %c0_55 = arith.constant 0 : index
    %c0_56 = arith.constant 0 : index
    %76 = vector.load %arg11[%c0_55, %c0_56] : memref<1x4xf32, #tpu.memory_space<vmem>>, vector<1x4xf32>
    %c0_57 = arith.constant 0 : index
    %c0_58 = arith.constant 0 : index
    %77 = vector.load %arg12[%c0_57, %c0_58] : memref<1x256xf32, #tpu.memory_space<vmem>>, vector<1x256xf32>
    %cst_59 = arith.constant dense<0.000000e+00> : vector<256xf32>
    %78 = vector.multi_reduction <add>, %73, %cst_59 [0] : vector<2x256xf32> to vector<256xf32>
    %79 = vector.shape_cast %78 : vector<256xf32> to vector<1x256xf32>
    %cst_60 = arith.constant dense<0.000000e+00> : vector<1x4xf32>
    %80 = tpu.matmul %79, %74, %cst_60 {dimension_numbers = #tpu.dot_dimension_numbers<[1], [0], [0], [1], [0, 0, 1, 1], [], []>} : vector<1x256xf32>, vector<256x4xf32>, vector<1x4xf32> -> vector<1x4xf32>
    %cst_61 = arith.constant 7.812500e-03 : f32
    %81 = vector.broadcast %cst_61 : f32 to vector<1x4xf32>
    %82 = arith.mulf %80, %81 : vector<1x4xf32>
    %cst_62 = arith.constant dense<0.000000e+00> : vector<1x256xf32>
    %83 = tpu.matmul %82, %75, %cst_62 {dimension_numbers = #tpu.dot_dimension_numbers<[1], [0], [0], [1], [0, 0, 1, 1], [], []>} : vector<1x4xf32>, vector<4x256xf32>, vector<1x256xf32> -> vector<1x256xf32>
    %84 = vector.broadcast %83 : vector<1x256xf32> to vector<2x256xf32>
    %85 = arith.subf %73, %84 : vector<2x256xf32>
    %86 = arith.mulf %85, %85 : vector<2x256xf32>
    %cst_63 = arith.constant dense<0.000000e+00> : vector<256xf32>
    %87 = vector.multi_reduction <add>, %86, %cst_63 [0] : vector<2x256xf32> to vector<256xf32>
    %88 = vector.shape_cast %87 : vector<256xf32> to vector<1x256xf32>
    %cst_64 = arith.constant dense<0.000000e+00> : vector<1x4xf32>
    %89 = tpu.matmul %88, %74, %cst_64 {dimension_numbers = #tpu.dot_dimension_numbers<[1], [0], [0], [1], [0, 0, 1, 1], [], []>} : vector<1x256xf32>, vector<256x4xf32>, vector<1x4xf32> -> vector<1x4xf32>
    %cst_65 = arith.constant 7.812500e-03 : f32
    %90 = vector.broadcast %cst_65 : f32 to vector<1x4xf32>
    %91 = arith.mulf %89, %90 : vector<1x4xf32>
    %cst_66 = arith.constant 9.99999974E-6 : f32
    %92 = vector.broadcast %cst_66 : f32 to vector<1x4xf32>
    %93 = arith.addf %91, %92 : vector<1x4xf32>
    %94 = math.rsqrt %93 : vector<1x4xf32>
    %95 = arith.mulf %76, %94 : vector<1x4xf32>
    %cst_67 = arith.constant dense<0.000000e+00> : vector<1x256xf32>
    %96 = tpu.matmul %95, %75, %cst_67 {dimension_numbers = #tpu.dot_dimension_numbers<[1], [0], [0], [1], [0, 0, 1, 1], [], []>} : vector<1x4xf32>, vector<4x256xf32>, vector<1x256xf32> -> vector<1x256xf32>
    %97 = vector.broadcast %96 : vector<1x256xf32> to vector<2x256xf32>
    %98 = arith.mulf %85, %97 : vector<2x256xf32>
    %99 = vector.broadcast %77 : vector<1x256xf32> to vector<2x256xf32>
    %100 = arith.addf %98, %99 : vector<2x256xf32>
    %101 = arith.addf %100, %0 : vector<2x256xf32>
    %cst_68 = arith.constant 0.000000e+00 : f32
    %102 = vector.broadcast %cst_68 : f32 to vector<2x256xf32>
    %103 = arith.maximumf %101, %102 : vector<2x256xf32>
    %c0_69 = arith.constant 0 : index
    %c0_70 = arith.constant 0 : index
    %104 = vector.load %arg15[%c0_69, %c0_70] : memref<2x256xf32, #tpu.memory_space<vmem>>, vector<2x256xf32>
    tpu.vector_store %arg15[%c0_69, %c0_70], %103 {strides = array<i32>} : memref<2x256xf32, #tpu.memory_space<vmem>>, vector<2x256xf32>,
    return
  }
}

</mosaic_0001>

<bundles_post_ra>
// kernel: tpu_custom_call.1
= control target key start
LH: loop header
LB: loop body
LE: loop exit
PB: predicated region body
PF: predicated region fallthrough
CT: control target
= control target key end

     0   :  { %s5011_s0 = inlined_call_operand.vmem [shape: f32[2,256], index: 0, kind: input, shape index: {}]   ;;  %s5012_s1 = inlined_call_operand.vmem [shape: f32[256,260], index: 1, kind: input, shape index: {}]   ;;  %s5013_s2 = inlined_call_operand.vmem [shape: f32[1,260], index: 2, kind: input, shape index: {}]   ;;  %s5014_s3 = inlined_call_operand.vmem [shape: f32[1,4], index: 3, kind: input, shape index: {}]   ;;  %s5015_s4 = inlined_call_operand.vmem [shape: f32[1,260], index: 4, kind: input, shape index: {}]   ;;  %s5016_s5 = inlined_call_operand.vmem [shape: f32[260,264], index: 5, kind: input, shape index: {}]   ;;  %s5017_s6 = inlined_call_operand.vmem [shape: f32[1,264], index: 6, kind: input, shape index: {}]   ;;  %s5018_s7 = inlined_call_operand.vmem [shape: f32[1,4], index: 7, kind: input, shape index: {}]   ;;  %s5019_s8 = inlined_call_operand.vmem [shape: f32[1,264], index: 8, kind: input, shape index: {}]   ;;  %s5020_s9 = inlined_call_operand.vmem [shape: f32[264,256], index: 9, kind: input, shape index: {}]   ;;  %s5021_s10 = inlined_call_operand.vmem [shape: f32[1,256], index: 10, kind: input, shape index: {}]   ;;  %s5022_s11 = inlined_call_operand.vmem [shape: f32[1,4], index: 11, kind: input, shape index: {}]   ;;  %s5023_s12 = inlined_call_operand.vmem [shape: f32[1,256], index: 12, kind: input, shape index: {}]   ;;  %s5024_s13 = inlined_call_operand.vmem [shape: f32[264,4], index: 13, kind: input, shape index: {}]   ;;  %s5025_s14 = inlined_call_operand.vmem [shape: f32[4,264], index: 14, kind: input, shape index: {}]   ;;  %s5026_s15 = inlined_call_operand.hbm [shape: f32[2,256], index: 15, kind: output, shape index: {}]  }
   0x1   :  { %v98_v0 = vld [vmem:[%s5012_s1 + $0x170] sm:$0xff]  ;;  %v97_v1 = vld [vmem:[%s5012_s1 + $0x168] sm:$0xff]  ;;  %v95_v2 = vld [vmem:[%s5012_s1 + $0x158] sm:$0xff] }
   0x2   :  { %176 = vmatprep.subr.mxu0 %v98_v0  ;;  %v94_v3 = vld [vmem:[%s5012_s1 + $0x150] sm:$0xff]  ;;  %v92_v4 = vld [vmem:[%s5012_s1 + $0x140] sm:$0xff]  ;;  %v91_v5 = vld [vmem:[%s5012_s1 + $0x138] sm:$0xff] }
   0x3   :  { %177 = vmatpush1.msra.mxu0 %v97_v1  ;;  %v89_v6 = vld [vmem:[%s5012_s1 + $0x128] sm:$0xff]  ;;  %v88_v7 = vld [vmem:[%s5012_s1 + $0x120] sm:$0xff]  ;;  %v86_v8 = vld [vmem:[%s5012_s1 + $0x110] sm:$0xff] }
   0x4   :  { %178 = vmatprep.subr.mxu0 %v95_v2  ;;  %v85_v9 = vld [vmem:[%s5012_s1 + $0x108] sm:$0xff]  ;;  %v83_v10 = vld [vmem:[%s5012_s1 + $0xf8] sm:$0xff]  ;;  %v82_v11 = vld [vmem:[%s5012_s1 + $0xf0] sm:$0xff] }
   0x5   :  { %179 = vmatpush1.msra.mxu0 %v94_v3  ;;  %v147_v12 = vld [vmem:[%s5012_s1 + $0x2f8] sm:$0xff]  ;;  %v80_v13 = vld [vmem:[%s5012_s1 + $0xe0] sm:$0xff]  ;;  %v77_v18 = vld [vmem:[%s5012_s1 + $0xc8] sm:$0xff] }
   0x6   :  { %180 = vmatprep.subr.mxu0 %v92_v4  ;;  %2870 = vmatprep.subr.mxu1 %v147_v12  ;;  %v99_v14 = vld [vmem:[%s5012_s1 + $0x178] sm:$0xff]  ;;  %v144_v15 = vld [vmem:[%s5012_s1 + $0x2e0] sm:$0xff]  ;;  %v141_v19 = vld [vmem:[%s5012_s1 + $0x2c8] sm:$0xff] }
   0x7   :  { %181 = vmatpush1.msra.mxu0 %v91_v5  ;;  %v79_v16 = vld [vmem:[%s5012_s1 + $0xd8] sm:$0xff]  ;;  %2871 = vmatpush3.msra.mxu1 %v99_v14  ;;  %v96_v17 = vld [vmem:[%s5012_s1 + $0x160] sm:$0xff]  ;;  %v93_v20 = vld [vmem:[%s5012_s1 + $0x148] sm:$0xff] }
   0x8   :  { %182 = vmatprep.subr.mxu0 %v89_v6  ;;  %2872 = vmatprep.subr.mxu1 %v144_v15  ;;  %v76_v21 = vld [vmem:[%s5012_s1 + $0xc0] sm:$0xff]  ;;  %v138_v22 = vld [vmem:[%s5012_s1 + $0x2b0] sm:$0xff]  ;;  %v73_v25 = vld [vmem:[%s5012_s1 + $0xa8] sm:$0xff] }
   0x9   :  { %183 = vmatpush1.msra.mxu0 %v88_v7  ;;  %2873 = vmatpush3.msra.mxu1 %v96_v17  ;;  %v74_v23 = vld [vmem:[%s5012_s1 + $0xb0] sm:$0xff]  ;;  %v135_v26 = vld [vmem:[%s5012_s1 + $0x298] sm:$0xff]  ;;  %v132_v30 = vld [vmem:[%s5012_s1 + $0x280] sm:$0xff] }
   0xa   :  { %184 = vmatprep.subr.mxu0 %v86_v8  ;;  %2874 = vmatprep.subr.mxu1 %v141_v19  ;;  %v90_v24 = vld [vmem:[%s5012_s1 + $0x130] sm:$0xff]  ;;  %v71_v27 = vld [vmem:[%s5012_s1 + $0x98] sm:$0xff]  ;;  %v68_v31 = vld [vmem:[%s5012_s1 + $0x80] sm:$0xff] }
   0xb   :  { %185 = vmatpush1.msra.mxu0 %v85_v9  ;;  %2875 = vmatpush3.msra.mxu1 %v93_v20  ;;  %v87_v28 = vld [vmem:[%s5012_s1 + $0x118] sm:$0xff]  ;;  %v70_v29 = vld [vmem:[%s5012_s1 + $0x90] sm:$0xff]  ;;  %v84_v32 = vld [vmem:[%s5012_s1 + $0x100] sm:$0xff] }
   0xc   :  { %186 = vmatprep.subr.mxu0 %v83_v10  ;;  %2876 = vmatprep.subr.mxu1 %v138_v22  ;;  %v67_v33 = vld [vmem:[%s5012_s1 + $0x78] sm:$0xff]  ;;  %v129_v34 = vld [vmem:[%s5012_s1 + $0x268] sm:$0xff]  ;;  %v64_v37 = vld [vmem:[%s5012_s1 + $0x60] sm:$0xff] }
   0xd   :  { %187 = vmatpush1.msra.mxu0 %v82_v11  ;;  %2877 = vmatpush3.msra.mxu1 %v90_v24  ;;  %v65_v35 = vld [vmem:[%s5012_s1 + $0x68] sm:$0xff]  ;;  %v126_v38 = vld [vmem:[%s5012_s1 + $0x250] sm:$0xff]  ;;  %v123_v42 = vld [vmem:[%s5012_s1 + $0x238] sm:$0xff] }
   0xe   :  { %188 = vmatprep.subr.mxu0 %v80_v13  ;;  %2878 = vmatprep.subr.mxu1 %v135_v26  ;;  %v81_v36 = vld [vmem:[%s5012_s1 + $0xe8] sm:$0xff]  ;;  %v62_v39 = vld [vmem:[%s5012_s1 + $0x50] sm:$0xff]  ;;  %v59_v43 = vld [vmem:[%s5012_s1 + $0x38] sm:$0xff] }
   0xf   :  { %189 = vmatpush1.msra.mxu0 %v79_v16  ;;  %2879 = vmatpush3.msra.mxu1 %v87_v28  ;;  %v78_v40 = vld [vmem:[%s5012_s1 + $0xd0] sm:$0xff]  ;;  %v61_v41 = vld [vmem:[%s5012_s1 + $0x48] sm:$0xff]  ;;  %v75_v44 = vld [vmem:[%s5012_s1 + $0xb8] sm:$0xff] }
  0x10   :  { %190 = vmatprep.subr.mxu0 %v77_v18  ;;  %2880 = vmatprep.subr.mxu1 %v132_v30  ;;  %v58_v45 = vld [vmem:[%s5012_s1 + $0x30] sm:$0xff]  ;;  %v120_v46 = vld [vmem:[%s5012_s1 + $0x220] sm:$0xff]  ;;  %v55_v49 = vld [vmem:[%s5012_s1 + $0x18] sm:$0xff] }
  0x11   :  { %191 = vmatpush1.msra.mxu0 %v76_v21  ;;  %2881 = vmatpush3.msra.mxu1 %v84_v32  ;;  %v56_v47 = vld [vmem:[%s5012_s1 + $0x20] sm:$0xff]  ;;  %v117_v50 = vld [vmem:[%s5012_s1 + $0x208] sm:$0xff]  ;;  %v114_v54 = vld [vmem:[%s5012_s1 + $0x1f0] sm:$0xff] }
  0x12   :  { %192 = vmatprep.subr.mxu0 %v74_v23  ;;  %2882 = vmatprep.subr.mxu1 %v129_v34  ;;  %v72_v48 = vld [vmem:[%s5012_s1 + $0xa0] sm:$0xff]  ;;  %v53_v51 = vld [vmem:[%s5012_s1 + $0x8] sm:$0xff]  ;;  %v146_v55 = vld [vmem:[%s5012_s1 + $0x2f0] sm:$0xff] }
  0x13   :  { %193 = vmatpush1.msra.mxu0 %v73_v25  ;;  %2883 = vmatpush3.msra.mxu1 %v81_v36  ;;  %v69_v52 = vld [vmem:[%s5012_s1 + $0x88] sm:$0xff]  ;;  %v52_v53 = vld [vmem:[%s5012_s1] sm:$0xff]  ;;  %v66_v56 = vld [vmem:[%s5012_s1 + $0x70] sm:$0xff] }
  0x14   :  { %194 = vmatprep.subr.mxu0 %v71_v27  ;;  %2884 = vmatprep.subr.mxu1 %v126_v38  ;;  %v145_v57 = vld [vmem:[%s5012_s1 + $0x2e8] sm:$0xff]  ;;  %v111_v58 = vld [vmem:[%s5012_s1 + $0x1d8] sm:$0xff]  ;;  %v142_v61 = vld [vmem:[%s5012_s1 + $0x2d0] sm:$0xff] }
  0x15   :  { %195 = vmatpush1.msra.mxu0 %v70_v29  ;;  %2885 = vmatpush3.msra.mxu1 %v78_v40  ;;  %v143_v59 = vld [vmem:[%s5012_s1 + $0x2d8] sm:$0xff]  ;;  %v140_v62 = vld [vmem:[%s5012_s1 + $0x2c0] sm:$0xff]  ;;  %v105_v2 = vld [vmem:[%s5012_s1 + $0x1a8] sm:$0xff] }
  0x16   :  { %196 = vmatprep.subr.mxu0 %v68_v31  ;;  %2886 = vmatprep.subr.mxu1 %v123_v42  ;;  %v63_v60 = vld [vmem:[%s5012_s1 + $0x58] sm:$0xff]  ;;  %v108_v63 = vld [vmem:[%s5012_s1 + $0x1c0] sm:$0xff] }
  0x17   :  { %197 = vmatpush1.msra.mxu0 %v67_v33  ;;  %2887 = vmatpush3.msra.mxu1 %v75_v44  ;;  %v139_v0 = vld [vmem:[%s5012_s1 + $0x2b8] sm:$0xff]  ;;  %v60_v1 = vld [vmem:[%s5012_s1 + $0x40] sm:$0xff] }
  0x18   :  { %198 = vmatprep.subr.mxu0 %v65_v35  ;;  %2888 = vmatprep.subr.mxu1 %v120_v46  ;;  %v3566_v3 = vld.sshfl [vmem:[%s5011_s0] sm:$0x33 pattern:$0x76325410] }
  0x19   :  { %199 = vmatpush1.msra.mxu0 %v64_v37  ;;  %2889 = vmatpush3.msra.mxu1 %v72_v48 }
  0x1a   :  { %200 = vmatprep.subr.mxu0 %v62_v39  ;;  %2890 = vmatprep.subr.mxu1 %v117_v50 }
  0x1b   :  { %201 = vmatpush1.msra.mxu0 %v61_v41  ;;  %2891 = vmatpush3.msra.mxu1 %v69_v52 }
  0x1c   :  { %202 = vmatprep.subr.mxu0 %v59_v43  ;;  %2892 = vmatprep.subr.mxu1 %v114_v54 }
  0x1d   :  { %203 = vmatpush1.msra.mxu0 %v58_v45  ;;  %2893 = vmatpush3.msra.mxu1 %v66_v56 }
  0x1e   :  { %204 = vmatprep.subr.mxu0 %v56_v47  ;;  %2894 = vmatprep.subr.mxu1 %v111_v58 }
  0x1f   :  { %205 = vmatpush1.msra.mxu0 %v55_v49  ;;  %2895 = vmatpush3.msra.mxu1 %v63_v60 }
  0x20   :  { %206 = vmatprep.subr.mxu0 %v53_v51 }
  0x21   :  { %207 = vmatpush1.msra.mxu0 %v52_v53 }
  0x22   :  { %208 = vmatprep.subr.mxu0 %v146_v55 }
  0x23   :  { %209 = vmatpush2.msra.mxu0 %v145_v57 }
  0x24   :  { %210 = vmatprep.subr.mxu0 %v143_v59 }
  0x25   :  { %20 = vsyncpa [#allocation3], 0  ;;  %211 = vmatpush2.msra.mxu0 %v142_v61  ;;  %v137_v4 = vld [vmem:[%s5012_s1 + $0x2a8] sm:$0xff]  ;;  %2896 = vmatprep.subr.mxu1 %v108_v63  ;;  %v136_v6 = vld [vmem:[%s5012_s1 + $0x2a0] sm:$0xff]  ;;  %v3588_v10 = vcombine.high %v3566_v3, %v3566_v3  ;;  %vm3280_vm0 = vmmov 0   ;;  %vm369_vm1 = vcmask 25600  }
  0x26   :  { %v57_v5 = vld [vmem:[%s5012_s1 + $0x28] sm:$0xff]  ;;  %212 = vmatprep.subr.mxu0 %v140_v62  ;;  %2897 = vmatpush3.msra.mxu1 %v60_v1  ;;  %v102_v7 = vld [vmem:[%s5012_s1 + $0x190] sm:$0xff]  ;;  %v131_v12 = vld [vmem:[%s5012_s1 + $0x278] sm:$0xff]  ;;  %vm354_vm2 = vcmask 1041408   ;;  %vm381_vm3 = vcmask 1043456   ;;  %vm377_vm4 = vcmask 31744  }
  0x27   :  { %213 = vmatpush2.msra.mxu0 %v139_v0  ;;  %v134_v8 = vld [vmem:[%s5012_s1 + $0x290] sm:$0xff]  ;;  %2898 = vmatprep.subr.mxu1 %v105_v2  ;;  %v133_v11 = vld [vmem:[%s5012_s1 + $0x288] sm:$0xff]  ;;  %v128_v14 = vld [vmem:[%s5012_s1 + $0x260] sm:$0xff]  ;;  %v5027_v2 = vmov 0.0   ;;  %vm1507_vm5 = vcmask 58368   ;;  %vm1515_vm6 = vcmask 64512  }
  0x28   :  { %v54_v9 = vld [vmem:[%s5012_s1 + $0x10] sm:$0xff]  ;;  %214 = vmatprep.subr.mxu0 %v137_v4  ;;  %2899 = vmatpush3.msra.mxu1 %v57_v5  ;;  %v3606_v15 = vld [vmem:[%s5024_s13 + $0xf8] sm:$0xff]  ;;  %v125_v18 = vld [vmem:[%s5012_s1 + $0x248] sm:$0xff] }
  0x29   :  { %215 = vmatpush2.msra.mxu0 %v136_v6  ;;  %2900 = vmatprep.subr.mxu1 %v102_v7  ;;  %v130_v13 = vld [vmem:[%s5012_s1 + $0x270] sm:$0xff]  ;;  %v127_v16 = vld [vmem:[%s5012_s1 + $0x258] sm:$0xff]  ;;  %v124_v20 = vld [vmem:[%s5012_s1 + $0x240] sm:$0xff] }
  0x2a   :  { %216 = vmatprep.subr.mxu0 %v134_v8  ;;  %2901 = vmatpush3.msra.mxu1 %v54_v9  ;;  %v3615_v17 = vld [vmem:[%s5024_s13 + $0x78] sm:$0xff]  ;;  %v3624_v19 = vld [vmem:[%s5024_s13 + $0xf0] sm:$0xff]  ;;  %v3642_v23 = vld [vmem:[%s5024_s13 + $0xe8] sm:$0xff] }
  0x2b   :  { %217 = vmatpush2.msra.mxu0 %v133_v11  ;;  %311 = vmatprep.mubr.f32.mxu1 %v3588_v10  ;;  %v3633_v21 = vld [vmem:[%s5024_s13 + $0x70] sm:$0xff]  ;;  %v121_v24 = vld [vmem:[%s5012_s1 + $0x228] sm:$0xff]  ;;  %v119_v26 = vld [vmem:[%s5012_s1 + $0x218] sm:$0xff] }
  0x2c   :  { %218 = vmatprep.subr.mxu0 %v131_v12  ;;  %312 = vmatmul.mubr.f32.vlgmr.msra.gmra.mxu1 %v3566_v3  ;;  %v122_v22 = vld [vmem:[%s5012_s1 + $0x230] sm:$0xff]  ;;  %v3651_v25 = vld [vmem:[%s5024_s13 + $0x68] sm:$0xff]  ;;  %v3660_v27 = vld [vmem:[%s5024_s13 + $0xe0] sm:$0xff] }
  0x2d   :  { %219 = vmatpush2.msra.mxu0 %v130_v13  ;;  %240 = vmatprep.mubr.f32.mxu0 %v3588_v10  ;;  %v118_v28 = vld [vmem:[%s5012_s1 + $0x210] sm:$0xff]  ;;  %v3669_v29 = vld [vmem:[%s5024_s13 + $0x60] sm:$0xff]  ;;  %v3678_v31 = vld [vmem:[%s5024_s13 + $0xd8] sm:$0xff] }
  0x2e   :  { %220 = vmatprep.subr.mxu0 %v128_v14  ;;  %2905 = vmatprep.subr.mxu1 %v3606_v15  ;;  %v116_v30 = vld [vmem:[%s5012_s1 + $0x200] sm:$0xff]  ;;  %v115_v32 = vld [vmem:[%s5012_s1 + $0x1f8] sm:$0xff]  ;;  %v113_v33 = vld [vmem:[%s5012_s1 + $0x1e8] sm:$0xff] }
  0x2f   :  { %221 = vmatpush2.msra.mxu0 %v127_v16  ;;  %2906 = vmatpush3.msra.mxu1 %v3615_v17  ;;  %v112_v34 = vld [vmem:[%s5012_s1 + $0x1e0] sm:$0xff]  ;;  %v110_v35 = vld [vmem:[%s5012_s1 + $0x1d0] sm:$0xff]  ;;  %v109_v36 = vld [vmem:[%s5012_s1 + $0x1c8] sm:$0xff] }
  0x30   :  { %222 = vmatprep.subr.mxu0 %v125_v18  ;;  %2907 = vmatprep.subr.mxu1 %v3624_v19  ;;  %v107_v37 = vld [vmem:[%s5012_s1 + $0x1b8] sm:$0xff]  ;;  %v106_v38 = vld [vmem:[%s5012_s1 + $0x1b0] sm:$0xff]  ;;  %v104_v39 = vld [vmem:[%s5012_s1 + $0x1a0] sm:$0xff] }
  0x31   :  { %223 = vmatpush2.msra.mxu0 %v124_v20  ;;  %2908 = vmatpush3.msra.mxu1 %v3633_v21  ;;  %v103_v40 = vld [vmem:[%s5012_s1 + $0x198] sm:$0xff]  ;;  %v101_v41 = vld [vmem:[%s5012_s1 + $0x188] sm:$0xff]  ;;  %v100_v42 = vld [vmem:[%s5012_s1 + $0x180] sm:$0xff] }
  0x32   :  { %224 = vmatprep.subr.mxu0 %v122_v22  ;;  %2909 = vmatprep.subr.mxu1 %v3642_v23  ;;  %v3720_v43 = vld [vmem:[%s5024_s13 + $0x58] sm:$0xff]  ;;  %v3725_v44 = vld [vmem:[%s5024_s13 + $0xd0] sm:$0xff]  ;;  %v3737_v46 = vld [vmem:[%s5024_s13 + $0xc8] sm:$0xff] }
  0x33   :  { %225 = vmatpush2.msra.mxu0 %v121_v24  ;;  %2910 = vmatpush3.msra.mxu1 %v3651_v25  ;;  %v3732_v45 = vld [vmem:[%s5024_s13 + $0x50] sm:$0xff]  ;;  %v3742_v47 = vld [vmem:[%s5024_s13 + $0x48] sm:$0xff]  ;;  %v3750_v48 = vld [vmem:[%s5024_s13 + $0xc0] sm:$0xff] }
  0x34   :  { %226 = vmatprep.subr.mxu0 %v119_v26  ;;  %2911 = vmatprep.subr.mxu1 %v3660_v27  ;;  %v3756_v49 = vld [vmem:[%s5024_s13 + $0x40] sm:$0xff]  ;;  %v3762_v50 = vld [vmem:[%s5024_s13 + $0xb8] sm:$0xff]  ;;  %v3774_v52 = vld [vmem:[%s5024_s13 + $0xb0] sm:$0xff] }
  0x35   :  { %227 = vmatpush2.msra.mxu0 %v118_v28  ;;  %2912 = vmatpush3.msra.mxu1 %v3669_v29  ;;  %v3768_v51 = vld [vmem:[%s5024_s13 + $0x38] sm:$0xff]  ;;  %v3780_v53 = vld [vmem:[%s5024_s13 + $0x30] sm:$0xff]  ;;  %v3786_v54 = vld [vmem:[%s5024_s13 + $0xa8] sm:$0xff] }
  0x36   :  { %228 = vmatprep.subr.mxu0 %v116_v30  ;;  %2913 = vmatprep.subr.mxu1 %v3678_v31  ;;  %v3792_v55 = vld [vmem:[%s5024_s13 + $0x28] sm:$0xff]  ;;  %v3798_v56 = vld [vmem:[%s5024_s13 + $0xa0] sm:$0xff]  ;;  %v3810_v58 = vld [vmem:[%s5024_s13 + $0x98] sm:$0xff] }
  0x37   :  { %229 = vmatpush2.msra.mxu0 %v115_v32  ;;  %2914 = vmatpush3.msra.mxu1 %v3720_v43  ;;  %v3804_v57 = vld [vmem:[%s5024_s13 + $0x20] sm:$0xff]  ;;  %v3816_v59 = vld [vmem:[%s5024_s13 + $0x18] sm:$0xff]  ;;  %v3822_v60 = vld [vmem:[%s5024_s13 + $0x90] sm:$0xff] }
  0x38   :  { %230 = vmatprep.subr.mxu0 %v113_v33  ;;  %2915 = vmatprep.subr.mxu1 %v3725_v44  ;;  %v3827_v61 = vld [vmem:[%s5024_s13 + $0x10] sm:$0xff]  ;;  %v3832_v62 = vld [vmem:[%s5024_s13 + $0x88] sm:$0xff]  ;;  %v3844_v0 = vld [vmem:[%s5024_s13 + $0x80] sm:$0xff] }
  0x39   :  { %231 = vmatpush2.msra.mxu0 %v112_v34  ;;  %2916 = vmatpush3.msra.mxu1 %v3732_v45  ;;  %v3838_v63 = vld [vmem:[%s5024_s13 + $0x8] sm:$0xff]  ;;  %v3850_v1 = vld [vmem:[%s5024_s13] sm:$0xff] }
  0x3a   :  { %232 = vmatprep.subr.mxu0 %v110_v35  ;;  %2917 = vmatprep.subr.mxu1 %v3737_v46  ;;  %v148_v7 = vld [vmem:[%s5013_s2] sm:$0x7] }
  0x3b   :  { %233 = vmatpush2.msra.mxu0 %v109_v36  ;;  %2918 = vmatpush3.msra.mxu1 %v3742_v47 }
  0x3c   :  { %234 = vmatprep.subr.mxu0 %v107_v37  ;;  %2919 = vmatprep.subr.mxu1 %v3750_v48 }
  0x3d   :  { %235 = vmatpush2.msra.mxu0 %v106_v38  ;;  %2920 = vmatpush3.msra.mxu1 %v3756_v49 }
  0x3e   :  { %236 = vmatprep.subr.mxu0 %v104_v39  ;;  %2921 = vmatprep.subr.mxu1 %v3762_v50 }
  0x3f   :  { %237 = vmatpush2.msra.mxu0 %v103_v40  ;;  %2922 = vmatpush3.msra.mxu1 %v3768_v51 }
  0x40   :  { %238 = vmatprep.subr.mxu0 %v101_v41  ;;  %2923 = vmatprep.subr.mxu1 %v3774_v52 }
  0x41   :  { %239 = vmatpush2.msra.mxu0 %v100_v42  ;;  %2924 = vmatpush3.msra.mxu1 %v3780_v53 }
  0x42   :  { %241 = vmatmul.mubr.f32.vlgmr.msra.gmra.mxu0 %v3566_v3  ;;  %2925 = vmatprep.subr.mxu1 %v3786_v54  ;;  %v150_v3 = vlaneseq }
  0x43   :  { %2926 = vmatpush3.msra.mxu1 %v3792_v55  ;;  %3173 = vmatprep.subr.mxu0 %v5027_v2 }
  0x44   :  { %2927 = vmatprep.subr.mxu1 %v3798_v56  ;;  %3175 = vmatprep.mubr.msk.f32.mxu0 %vm3280_vm0, %v5027_v2  ;;  %v151_v4 = vshrl.u32 %v150_v3, 7 }
  0x45   :  { %2928 = vmatpush3.msra.mxu1 %v3804_v57 }
  0x46   :  { %2929 = vmatprep.subr.mxu1 %v3810_v58  ;;  %v3859_v6 = vsub.s32 2, %v151_v4  ;;  %v3865_v12 = vsub.s32 0, %v151_v4  ;;  %v3869_v14 = vsub.s32 1, %v151_v4 }
  0x47   :  { %2930 = vmatpush3.msra.mxu1 %v3816_v59 }
  0x48   :  { %2931 = vmatprep.subr.mxu1 %v3822_v60  ;;  %v161_v9 = vrot.slane %v148_v7, %v3859_v6  ;;  %v153_v16 = vrot.slane %v148_v7, %v3865_v12  ;;  %v157_v20 = vrot.slane %v148_v7, %v3869_v14 }
  0x49   :  { %2932 = vmatpush3.msra.mxu1 %v3827_v61 }
  0x4a   :  { %2933 = vmatprep.subr.mxu1 %v3832_v62 }
  0x4b   :  { %2934 = vmatpush3.msra.mxu1 %v3838_v63 }
  0x4c   :  { %2935 = vmatprep.subr.mxu1 %v3844_v0 }
  0x4d   :  { %2936 = vmatpush3.msra.mxu1 %v3850_v1 }
  0x4e   :  { %3168 = vmatprep.subr.mxu1 %v5027_v2 }
  0xec   :  { %v2902_v5 = vpop.f32.mrf.mxu1 }
  0xee   :  { %v2903_v8 = vpop.f32.mrf.mxu1 }
  0xef   :  { %v2904_v11 = vadd.f32 %v2903_v8, %v2902_v5 }
  0xf1   :  { %v3867_v13 = vadd.f32 %v2904_v11, %v161_v9 }
  0xf3   :  { %v370_v18 = vsel %vm369_vm1, %v3867_v13, 0.0 }
  0xf4   :  { %v371_v24 = vrot.slane %v370_v18, 4 }
  0xf6   :  { %v372_v34 = vadd.f32 %v371_v24, %v370_v18  ;;  %v3905_v24 = vld [vmem:[%s5025_s14 + $0x8] sm:$0xf] }
  0xf7   :  { %3174 = vmatpush3.msk.msra.mxu0 %vm381_vm3, %v3905_v24 }
  0xf8   :  { %v373_v40 = vrot.slane %v372_v34, 2  ;;  %3178 = vmatprep.subr.mxu0 %v5027_v2 }
  0xfa   :  { %v374_v4 = vadd.f32 %v373_v40, %v372_v34 }
  0xfc   :  { %v375_v9 = vrot.slane %v374_v4, 1 }
  0xfe   :  { %v376_v18 = vadd.f32 %v375_v9, %v374_v4 }
 0x102   :  { %v242_v22 = vpop.f32.mrf.mxu0 }
 0x103   :  { %v3875_v26 = vadd.f32 %v242_v22, %v153_v16  ;;  %v349_v16 = vld [vmem:[%s5024_s13 + $0x100] sm:$0xf] }
 0x104   :  { %v244_v28 = vpop.f32.mrf.mxu0 }
 0x105   :  { %v355_v30 = vsel %vm354_vm2, %v3875_v26, 0.0  ;;  %v3879_v32 = vadd.f32 %v244_v28, %v157_v20  ;;  %v3894_v20 = vld [vmem:[%s5025_s14] sm:$0xff] }
 0x106   :  { %v356_v33 = vrot.slane %v355_v30, 4  ;;  %v3898_v22 = vcombine.high %v3894_v20, %v3894_v20 }
 0x107   :  { %v362_v35 = vsel %vm354_vm2, %v3879_v32, 0.0 }
 0x108   :  { %v357_v36 = vadd.f32 %v356_v33, %v355_v30  ;;  %v363_v37 = vrot.slane %v362_v35, 4 }
 0x10a   :  { %v358_v38 = vrot.slane %v357_v36, 2  ;;  %v364_v39 = vadd.f32 %v363_v37, %v362_v35 }
 0x10c   :  { %v359_v41 = vadd.f32 %v358_v38, %v357_v36  ;;  %v365_v42 = vrot.slane %v364_v39, 2 }
 0x10e   :  { %v366_v3 = vadd.f32 %v365_v42, %v364_v39  ;;  %v360_v5 = vrot.slane %v359_v41, 1 }
 0x110   :  { %v367_v7 = vrot.slane %v366_v3, 1  ;;  %v361_v11 = vadd.f32 %v360_v5, %v359_v41 }
 0x112   :  { %v368_v8 = vadd.f32 %v367_v7, %v366_v3 }
 0x114   :  { %449 = vmatprep.mubr.f32.mxu1 %v368_v8 }
 0x115   :  { %450 = vmatmul.mubr.f32.vlgmr.msra.gmra.mxu1 %v361_v11 }
 0x116   :  { %3169 = vmatpush3.msk.msra.mxu1 %vm381_vm3, %v349_v16  ;;  %3170 = vmatprep.mubr.msk.f32.mxu1 %vm3280_vm0, %v5027_v2 }
 0x117   :  { %2833 = vmatprep.subr.msk.mxu1 %vm381_vm3, %v3898_v22 }
 0x119   :  { %3171 = vmatmul.mubr.msk.f32.vlgmr.msra.gmra.mxu1 %vm377_vm4, %v376_v18 }
 0x11a   :  { %602 = vmatprep.mubr.f32.mxu1 %v5027_v2  ;;  %2834 = vmatpush1.msk.msra.mxu1 %vm381_vm3, %v3894_v20 }
 0x11b   :  { %2944 = vmatprep.subr.mxu1 %v3606_v15 }
 0x1d5   :  { %v2937_v28 = vpop.f32.mrf.mxu1 }
 0x1d7   :  { %v2938_v30 = vpop.f32.mrf.mxu1 }
 0x1d8   :  { %v2939_v33 = vadd.f32 %v2938_v30, %v2937_v28 }
 0x1d9   :  { %v521_v34 = vpop.f32.mrf.mxu1 }
 0x1da   :  { %v522_v35 = vadd.f32 %v2939_v33, %v521_v34 }
 0x1db   :  { %v3172_v36 = vpop.f32.mrf.mxu1 }
 0x1dc   :  { %v525_v37 = vmul.f32 0.0076923077, %v522_v35 }
 0x1de   :  { %2835 = vmatmul.mubr.msk.f32.vlgmr.msra.gmra.mxu1 %vm377_vm4, %v525_v37  ;;  %3176 = vmatmul.mubr.msk.f32.vlgmr.msra.gmra.mxu0 %vm377_vm4, %v525_v37 }
 0x1df   :  { %2945 = vmatpush3.msra.mxu1 %v3615_v17  ;;  %3179 = vmatpush3.msk.msra.mxu0 %vm381_vm3, %v349_v16 }
 0x1e0   :  { %2946 = vmatprep.subr.mxu1 %v3624_v19  ;;  %3180 = vmatprep.mubr.msk.f32.mxu0 %vm3280_vm0, %v5027_v2 }
 0x1e1   :  { %2947 = vmatpush3.msra.mxu1 %v3633_v21  ;;  %2840 = vmatprep.subr.msk.mxu0 %vm381_vm3, %v3898_v22 }
 0x1e2   :  { %2948 = vmatprep.subr.mxu1 %v3642_v23 }
 0x1e3   :  { %2949 = vmatpush3.msra.mxu1 %v3651_v25 }
 0x1e4   :  { %2950 = vmatprep.subr.mxu1 %v3660_v27 }
 0x1e5   :  { %2951 = vmatpush3.msra.mxu1 %v3669_v29 }
 0x1e6   :  { %2952 = vmatprep.subr.mxu1 %v3678_v31 }
 0x1e7   :  { %2953 = vmatpush3.msra.mxu1 %v3720_v43 }
 0x1e8   :  { %2954 = vmatprep.subr.mxu1 %v3725_v44 }
 0x1e9   :  { %2955 = vmatpush3.msra.mxu1 %v3732_v45 }
 0x1ea   :  { %2956 = vmatprep.subr.mxu1 %v3737_v46 }
 0x1eb   :  { %2957 = vmatpush3.msra.mxu1 %v3742_v47 }
 0x1ec   :  { %2958 = vmatprep.subr.mxu1 %v3750_v48 }
 0x1ed   :  { %2959 = vmatpush3.msra.mxu1 %v3756_v49 }
 0x1ee   :  { %2960 = vmatprep.subr.mxu1 %v3762_v50 }
 0x1ef   :  { %2961 = vmatpush3.msra.mxu1 %v3768_v51 }
 0x1f0   :  { %2962 = vmatprep.subr.mxu1 %v3774_v52 }
 0x1f1   :  { %2963 = vmatpush3.msra.mxu1 %v3780_v53 }
 0x1f2   :  { %2964 = vmatprep.subr.mxu1 %v3786_v54 }
 0x1f3   :  { %2965 = vmatpush3.msra.mxu1 %v3792_v55 }
 0x1f4   :  { %2966 = vmatprep.subr.mxu1 %v3798_v56 }
 0x1f5   :  { %2967 = vmatpush3.msra.mxu1 %v3804_v57 }
 0x1f6   :  { %2968 = vmatprep.subr.mxu1 %v3810_v58 }
 0x1f7   :  { %2969 = vmatpush3.msra.mxu1 %v3816_v59 }
 0x1f8   :  { %2970 = vmatprep.subr.mxu1 %v3822_v60 }
 0x1f9   :  { %2971 = vmatpush3.msra.mxu1 %v3827_v61 }
 0x1fa   :  { %2972 = vmatprep.subr.mxu1 %v3832_v62 }
 0x1fb   :  { %2973 = vmatpush3.msra.mxu1 %v3838_v63 }
 0x1fc   :  { %2974 = vmatprep.subr.mxu1 %v3844_v0 }
 0x1fd   :  { %2975 = vmatpush3.msra.mxu1 %v3850_v1 }
 0x29e   :  { %v604_v38 = vpop.f32.mrf.mxu1  ;;  %v675_v39 = vpop.f32.mrf.mxu0 }
 0x29f   :  { %v682_v40 = vrot.slane %v604_v38, %v3865_v12  ;;  %v690_v41 = vrot.slane %v675_v39, %v3865_v12 }
 0x2a0   :  { %v606_v42 = vpop.f32.mrf.mxu1  ;;  %v3177_v3 = vpop.f32.mrf.mxu0 }
 0x2a1   :  { %v3954_v4 = vsub.f32 %v3875_v26, %v682_v40  ;;  %v3957_v5 = vsub.f32 %v3867_v13, %v690_v41  ;;  %v686_v7 = vrot.slane %v606_v42, %v3865_v12 }
 0x2a3   :  { %v694_v8 = vmul.f32 %v3954_v4, %v3954_v4  ;;  %v696_v9 = vmul.f32 %v3957_v5, %v3957_v5  ;;  %v3965_v11 = vsub.f32 %v3879_v32, %v686_v7 }
 0x2a5   :  { %v697_v16 = vsel %vm354_vm2, %v694_v8, 0.0  ;;  %v711_v18 = vsel %vm369_vm1, %v696_v9, 0.0  ;;  %v695_v26 = vmul.f32 %v3965_v11, %v3965_v11 }
 0x2a6   :  { %v698_v13 = vrot.slane %v697_v16, 4  ;;  %v712_v28 = vrot.slane %v711_v18, 4 }
 0x2a7   :  { %v704_v30 = vsel %vm354_vm2, %v695_v26, 0.0 }
 0x2a8   :  { %v699_v33 = vadd.f32 %v698_v13, %v697_v16  ;;  %v713_v34 = vadd.f32 %v712_v28, %v711_v18  ;;  %v705_v35 = vrot.slane %v704_v30, 4  ;;  %v5029_v16 = vmov 0.0  }
 0x2aa   :  { %v700_v36 = vrot.slane %v699_v33, 2  ;;  %v714_v37 = vrot.slane %v713_v34, 2  ;;  %v706_v38 = vadd.f32 %v705_v35, %v704_v30 }
 0x2ac   :  { %v715_v39 = vadd.f32 %v714_v37, %v713_v34  ;;  %v707_v32 = vrot.slane %v706_v38, 2  ;;  %v701_v40 = vadd.f32 %v700_v36, %v699_v33  ;;  %v352_v36 = vld [vmem:[%s5014_s3] sm:$0x1] }
 0x2ae   :  { %v716_v41 = vrot.slane %v715_v39, 1  ;;  %v708_v42 = vadd.f32 %v707_v32, %v706_v38  ;;  %v702_v3 = vrot.slane %v701_v40, 1  ;;  %v1089_v32 = vld [vmem:[%s5016_s5 + $0x158] sm:$0xff] }
 0x2b0   :  { %v717_v7 = vadd.f32 %v716_v41, %v715_v39  ;;  %v709_v8 = vrot.slane %v708_v42, 1  ;;  %v703_v2 = vadd.f32 %v702_v3, %v701_v40  ;;  %v1091_v39 = vld [vmem:[%s5016_s5 + $0x168] sm:$0xff]  ;;  %v1088_v40 = vld [vmem:[%s5016_s5 + $0x150] sm:$0xff]  ;;  %v1085_v41 = vld [vmem:[%s5016_s5 + $0x138] sm:$0xff] }
 0x2b1   :  { %v1082_v3 = vld [vmem:[%s5016_s5 + $0x120] sm:$0xff] }
 0x2b2   :  { %3181 = vmatmul.mubr.msk.f32.vlgmr.msra.gmra.mxu0 %vm377_vm4, %v717_v7  ;;  %v710_v9 = vadd.f32 %v709_v8, %v708_v42  ;;  %v1083_v42 = vld [vmem:[%s5016_s5 + $0x128] sm:$0xff]  ;;  %v1080_v7 = vld [vmem:[%s5016_s5 + $0x110] sm:$0xff] }
 0x2b3   :  { %2841 = vmatpush1.msk.msra.mxu0 %vm381_vm3, %v3894_v20  ;;  %932 = vmatprep.mubr.f32.mxu0 %v5029_v16  ;;  %v1079_v8 = vld [vmem:[%s5016_s5 + $0x108] sm:$0xff] }
 0x2b4   :  { %785 = vmatprep.mubr.f32.mxu1 %v710_v9  ;;  %3183 = vmatprep.subr.mxu0 %v5029_v16  ;;  %v1077_v9 = vld [vmem:[%s5016_s5 + $0xf8] sm:$0xff] }
 0x2b5   :  { %786 = vmatmul.mubr.f32.vlgmr.msra.gmra.mxu1 %v703_v2  ;;  %v1092_v2 = vld [vmem:[%s5016_s5 + $0x170] sm:$0xff] }
 0x2b6   :  { %1309 = vmatprep.mubr.f32.mxu1 %v5029_v16 }
 0x372   :  { %v857_v18 = vpop.f32.mrf.mxu0 }
 0x374   :  { %v3182_v26 = vpop.f32.mrf.mxu0 }
 0x375   :  { %v2976_v13 = vpop.f32.mrf.mxu1  ;;  %v1074_v26 = vld [vmem:[%s5016_s5 + $0xe0] sm:$0xff] }
 0x377   :  { %v2977_v28 = vpop.f32.mrf.mxu1 }
 0x378   :  { %v2978_v30 = vadd.f32 %v2977_v28, %v2976_v13  ;;  %v1073_v13 = vld [vmem:[%s5016_s5 + $0xd8] sm:$0xff]  ;;  %v1071_v28 = vld [vmem:[%s5016_s5 + $0xc8] sm:$0xff] }
 0x37a   :  { %v858_v33 = vadd.f32 %v2978_v30, %v857_v18  ;;  %v1076_v18 = vld [vmem:[%s5016_s5 + $0xf0] sm:$0xff]  ;;  %v1070_v30 = vld [vmem:[%s5016_s5 + $0xc0] sm:$0xff] }
 0x37c   :  { %v861_v34 = vmul.f32 0.0076923077, %v858_v33  ;;  %v1068_v33 = vld [vmem:[%s5016_s5 + $0xb0] sm:$0xff] }
 0x37e   :  { %v862_v35 = vadd.f32 1e-05, %v861_v34  ;;  %v1067_v34 = vld [vmem:[%s5016_s5 + $0xa8] sm:$0xff] }
 0x380   :  { %3218 = vrsqrt.f32 %v862_v35  ;;  %v1065_v35 = vld [vmem:[%s5016_s5 + $0x98] sm:$0xff] }
 0x38d   :  { %v3219_v37 = vpop.eup %3218 }
 0x38e   :  { %v864_v38 = vmul.f32 %v3219_v37, %v352_v36  ;;  %v1064_v36 = vld [vmem:[%s5016_s5 + $0x90] sm:$0xff]  ;;  %v1062_v37 = vld [vmem:[%s5016_s5 + $0x80] sm:$0xff] }
 0x390   :  { %2842 = vmatmul.mubr.msk.f32.vlgmr.msra.gmra.mxu0 %vm377_vm4, %v864_v38 }
 0x391   :  { %3184 = vmatpush3.msk.msra.mxu0 %vm381_vm3, %v3905_v24  ;;  %3185 = vmatprep.mubr.msk.f32.mxu0 %vm3280_vm0, %v5029_v16  ;;  %v1086_v24 = vld [vmem:[%s5016_s5 + $0x140] sm:$0xff] }
 0x392   :  { %1174 = vmatprep.subr.mxu0 %v1092_v2  ;;  %v1059_v2 = vld [vmem:[%s5016_s5 + $0x68] sm:$0xff] }
 0x394   :  { %3186 = vmatmul.mubr.msk.f32.vlgmr.msra.gmra.mxu0 %vm377_vm4, %v864_v38  ;;  %v1061_v38 = vld [vmem:[%s5016_s5 + $0x78] sm:$0xff] }
 0x395   :  { %1175 = vmatpush1.msra.mxu0 %v1091_v39  ;;  %v1058_v39 = vld [vmem:[%s5016_s5 + $0x60] sm:$0xff] }
 0x396   :  { %1176 = vmatprep.subr.mxu0 %v1089_v32  ;;  %v1056_v32 = vld [vmem:[%s5016_s5 + $0x50] sm:$0xff] }
 0x397   :  { %1177 = vmatpush1.msra.mxu0 %v1088_v40  ;;  %v1055_v40 = vld [vmem:[%s5016_s5 + $0x48] sm:$0xff] }
 0x398   :  { %1178 = vmatprep.subr.mxu0 %v1086_v24  ;;  %v1053_v24 = vld [vmem:[%s5016_s5 + $0x38] sm:$0xff] }
 0x399   :  { %1179 = vmatpush1.msra.mxu0 %v1085_v41  ;;  %v1052_v41 = vld [vmem:[%s5016_s5 + $0x30] sm:$0xff] }
 0x39a   :  { %1180 = vmatprep.subr.mxu0 %v1083_v42  ;;  %v1050_v42 = vld [vmem:[%s5016_s5 + $0x20] sm:$0xff] }
 0x39b   :  { %1181 = vmatpush1.msra.mxu0 %v1082_v3  ;;  %v1049_v3 = vld [vmem:[%s5016_s5 + $0x18] sm:$0xff] }
 0x39c   :  { %1182 = vmatprep.subr.mxu0 %v1080_v7  ;;  %v1047_v7 = vld [vmem:[%s5016_s5 + $0x8] sm:$0xff] }
 0x39d   :  { %1183 = vmatpush1.msra.mxu0 %v1079_v8  ;;  %v1046_v8 = vld [vmem:[%s5016_s5] sm:$0xff] }
 0x39e   :  { %1184 = vmatprep.subr.mxu0 %v1077_v9  ;;  %v1140_v9 = vld [vmem:[%s5016_s5 + $0x2f0] sm:$0xff] }
 0x39f   :  { %1185 = vmatpush1.msra.mxu0 %v1076_v18  ;;  %v1139_v18 = vld [vmem:[%s5016_s5 + $0x2e8] sm:$0xff] }
 0x3a0   :  { %1186 = vmatprep.subr.mxu0 %v1074_v26  ;;  %v1137_v26 = vld [vmem:[%s5016_s5 + $0x2d8] sm:$0xff] }
 0x3a1   :  { %1187 = vmatpush1.msra.mxu0 %v1073_v13  ;;  %v1136_v13 = vld [vmem:[%s5016_s5 + $0x2d0] sm:$0xff] }
 0x3a2   :  { %1188 = vmatprep.subr.mxu0 %v1071_v28  ;;  %v1134_v28 = vld [vmem:[%s5016_s5 + $0x2c0] sm:$0xff] }
 0x3a3   :  { %1189 = vmatpush1.msra.mxu0 %v1070_v30  ;;  %v1133_v30 = vld [vmem:[%s5016_s5 + $0x2b8] sm:$0xff] }
 0x3a4   :  { %1190 = vmatprep.subr.mxu0 %v1068_v33  ;;  %v1131_v33 = vld [vmem:[%s5016_s5 + $0x2a8] sm:$0xff] }
 0x3a5   :  { %1191 = vmatpush1.msra.mxu0 %v1067_v34  ;;  %v1130_v34 = vld [vmem:[%s5016_s5 + $0x2a0] sm:$0xff] }
 0x3a6   :  { %1192 = vmatprep.subr.mxu0 %v1065_v35  ;;  %v1128_v35 = vld [vmem:[%s5016_s5 + $0x290] sm:$0xff] }
 0x3a7   :  { %1193 = vmatpush1.msra.mxu0 %v1064_v36  ;;  %v1127_v36 = vld [vmem:[%s5016_s5 + $0x288] sm:$0xff] }
 0x3a8   :  { %1194 = vmatprep.subr.mxu0 %v1062_v37  ;;  %v1125_v37 = vld [vmem:[%s5016_s5 + $0x278] sm:$0xff] }
 0x3a9   :  { %1195 = vmatpush1.msra.mxu0 %v1061_v38  ;;  %v1124_v38 = vld [vmem:[%s5016_s5 + $0x270] sm:$0xff] }
 0x3aa   :  { %1196 = vmatprep.subr.mxu0 %v1059_v2  ;;  %v1122_v2 = vld [vmem:[%s5016_s5 + $0x260] sm:$0xff] }
 0x3ab   :  { %1197 = vmatpush1.msra.mxu0 %v1058_v39  ;;  %v1121_v39 = vld [vmem:[%s5016_s5 + $0x258] sm:$0xff] }
 0x3ac   :  { %1198 = vmatprep.subr.mxu0 %v1056_v32  ;;  %v1119_v32 = vld [vmem:[%s5016_s5 + $0x248] sm:$0xff] }
 0x3ad   :  { %1199 = vmatpush1.msra.mxu0 %v1055_v40  ;;  %v1118_v40 = vld [vmem:[%s5016_s5 + $0x240] sm:$0xff] }
 0x3ae   :  { %1200 = vmatprep.subr.mxu0 %v1053_v24  ;;  %v1116_v24 = vld [vmem:[%s5016_s5 + $0x230] sm:$0xff] }
 0x3af   :  { %1201 = vmatpush1.msra.mxu0 %v1052_v41  ;;  %v1115_v41 = vld [vmem:[%s5016_s5 + $0x228] sm:$0xff] }
 0x3b0   :  { %1202 = vmatprep.subr.mxu0 %v1050_v42  ;;  %v1113_v42 = vld [vmem:[%s5016_s5 + $0x218] sm:$0xff] }
 0x3b1   :  { %1203 = vmatpush1.msra.mxu0 %v1049_v3  ;;  %v1112_v3 = vld [vmem:[%s5016_s5 + $0x210] sm:$0xff] }
 0x3b2   :  { %1204 = vmatprep.subr.mxu0 %v1047_v7  ;;  %v1110_v7 = vld [vmem:[%s5016_s5 + $0x200] sm:$0xff] }
 0x3b3   :  { %1205 = vmatpush1.msra.mxu0 %v1046_v8  ;;  %v1109_v8 = vld [vmem:[%s5016_s5 + $0x1f8] sm:$0xff] }
 0x3b4   :  { %1206 = vmatprep.subr.mxu0 %v1140_v9  ;;  %v1107_v9 = vld [vmem:[%s5016_s5 + $0x1e8] sm:$0xff] }
 0x3b5   :  { %1207 = vmatpush2.msra.mxu0 %v1139_v18  ;;  %v1106_v18 = vld [vmem:[%s5016_s5 + $0x1e0] sm:$0xff] }
 0x3b6   :  { %1208 = vmatprep.subr.mxu0 %v1137_v26  ;;  %v1104_v26 = vld [vmem:[%s5016_s5 + $0x1d0] sm:$0xff] }
 0x3b7   :  { %1209 = vmatpush2.msra.mxu0 %v1136_v13  ;;  %v1103_v13 = vld [vmem:[%s5016_s5 + $0x1c8] sm:$0xff] }
 0x3b8   :  { %1210 = vmatprep.subr.mxu0 %v1134_v28  ;;  %v1101_v28 = vld [vmem:[%s5016_s5 + $0x1b8] sm:$0xff] }
 0x3b9   :  { %1211 = vmatpush2.msra.mxu0 %v1133_v30  ;;  %v1100_v30 = vld [vmem:[%s5016_s5 + $0x1b0] sm:$0xff] }
 0x3ba   :  { %1212 = vmatprep.subr.mxu0 %v1131_v33  ;;  %v1098_v33 = vld [vmem:[%s5016_s5 + $0x1a0] sm:$0xff] }
 0x3bb   :  { %1213 = vmatpush2.msra.mxu0 %v1130_v34  ;;  %v1097_v34 = vld [vmem:[%s5016_s5 + $0x198] sm:$0xff] }
 0x3bc   :  { %1214 = vmatprep.subr.mxu0 %v1128_v35  ;;  %v1143_v35 = vld [vmem:[%s5016_s5 + $0x308] sm:$0xf] }
 0x3bd   :  { %1215 = vmatpush2.msra.mxu0 %v1127_v36  ;;  %v1095_v36 = vld [vmem:[%s5016_s5 + $0x188] sm:$0xff]  ;;  %2845 = vmatprep.subr.msk.mxu1 %vm381_vm3, %v1143_v35 }
 0x3be   :  { %1216 = vmatprep.subr.mxu0 %v1125_v37  ;;  %v1142_v37 = vld [vmem:[%s5016_s5 + $0x300] sm:$0xf] }
 0x3bf   :  { %1217 = vmatpush2.msra.mxu0 %v1124_v38  ;;  %v1094_v38 = vld [vmem:[%s5016_s5 + $0x180] sm:$0xff]  ;;  %2846 = vmatpush1.msk.msra.mxu1 %vm381_vm3, %v1142_v37 }
 0x3c0   :  { %1218 = vmatprep.subr.mxu0 %v1122_v2  ;;  %v1141_v2 = vld [vmem:[%s5016_s5 + $0x2f8] sm:$0xff]  ;;  %v1090_v37 = vld [vmem:[%s5016_s5 + $0x160] sm:$0xff] }
 0x3c1   :  { %1219 = vmatpush2.msra.mxu0 %v1121_v39  ;;  %2983 = vmatprep.subr.mxu1 %v1141_v2  ;;  %v353_v39 = vld [vmem:[%s5015_s4] sm:$0x7]  ;;  %v1087_v2 = vld [vmem:[%s5016_s5 + $0x148] sm:$0xff] }
 0x3c2   :  { %1220 = vmatprep.subr.mxu0 %v1119_v32 }
 0x3c3   :  { %1221 = vmatpush2.msra.mxu0 %v1118_v40 }
 0x3c4   :  { %1222 = vmatprep.subr.mxu0 %v1116_v24  ;;  %v1028_v24 = vrot.slane %v353_v39, %v3865_v12 }
 0x3c5   :  { %1223 = vmatpush2.msra.mxu0 %v1115_v41 }
 0x3c6   :  { %1224 = vmatprep.subr.mxu0 %v1113_v42 }
 0x3c7   :  { %1225 = vmatpush2.msra.mxu0 %v1112_v3 }
 0x3c8   :  { %1226 = vmatprep.subr.mxu0 %v1110_v7  ;;  %v1032_v7 = vrot.slane %v353_v39, %v3869_v14 }
 0x3c9   :  { %1227 = vmatpush2.msra.mxu0 %v1109_v8 }
 0x3ca   :  { %1228 = vmatprep.subr.mxu0 %v1107_v9 }
 0x3cb   :  { %1229 = vmatpush2.msra.mxu0 %v1106_v18 }
 0x3cc   :  { %1230 = vmatprep.subr.mxu0 %v1104_v26  ;;  %v1036_v26 = vrot.slane %v353_v39, %v3859_v6  ;;  %v1132_v39 = vld [vmem:[%s5016_s5 + $0x2b0] sm:$0xff] }
 0x3cd   :  { %1231 = vmatpush2.msra.mxu0 %v1103_v13 }
 0x3ce   :  { %1232 = vmatprep.subr.mxu0 %v1101_v28 }
 0x3cf   :  { %1233 = vmatpush2.msra.mxu0 %v1100_v30 }
 0x3d0   :  { %1234 = vmatprep.subr.mxu0 %v1098_v33 }
 0x3d1   :  { %1235 = vmatpush2.msra.mxu0 %v1097_v34 }
 0x3d2   :  { %1236 = vmatprep.subr.mxu0 %v1095_v36 }
 0x3d3   :  { %1237 = vmatpush2.msra.mxu0 %v1094_v38  ;;  %v1135_v38 = vld [vmem:[%s5016_s5 + $0x2c8] sm:$0xff] }
 0x3d4   :  { %3193 = vmatprep.subr.mxu0 %v5029_v16 }
 0x450   :  { %v934_v32 = vpop.f32.mrf.mxu0 }
 0x451   :  { %v1012_v40 = vrot.slane %v934_v32, %v3865_v12  ;;  %v1084_v32 = vld [vmem:[%s5016_s5 + $0x130] sm:$0xff] }
 0x452   :  { %v936_v41 = vpop.f32.mrf.mxu0 }
 0x453   :  { %v1021_v42 = vmul.f32 %v1012_v40, %v3954_v4  ;;  %v1016_v3 = vrot.slane %v936_v41, %v3865_v12  ;;  %v1129_v40 = vld [vmem:[%s5016_s5 + $0x298] sm:$0xff]  ;;  %v1126_v41 = vld [vmem:[%s5016_s5 + $0x280] sm:$0xff] }
 0x454   :  { %v1005_v8 = vpop.f32.mrf.mxu0 }
 0x455   :  { %v1022_v9 = vmul.f32 %v1016_v3, %v3965_v11  ;;  %v1020_v18 = vrot.slane %v1005_v8, %v3865_v12  ;;  %v4202_v13 = vadd.f32 %v1028_v24, %v1021_v42  ;;  %v1093_v11 = vld [vmem:[%s5016_s5 + $0x178] sm:$0xff]  ;;  %v1078_v42 = vld [vmem:[%s5016_s5 + $0x100] sm:$0xff]  ;;  %v1123_v3 = vld [vmem:[%s5016_s5 + $0x268] sm:$0xff] }
 0x456   :  { %v3187_v28 = vpop.f32.mrf.mxu0  ;;  %v1081_v24 = vld [vmem:[%s5016_s5 + $0x118] sm:$0xff]  ;;  %v1120_v8 = vld [vmem:[%s5016_s5 + $0x250] sm:$0xff] }
 0x457   :  { %v1023_v30 = vmul.f32 %v1020_v18, %v3957_v5  ;;  %v1041_v33 = vadd.f32 %v1032_v7, %v1022_v9  ;;  %v1043_v35 = vmax.f32 %v4202_v13, 0.0  ;;  %v1138_v5 = vld [vmem:[%s5016_s5 + $0x2e0] sm:$0xff]  ;;  %v1075_v7 = vld [vmem:[%s5016_s5 + $0xe8] sm:$0xff]  ;;  %v1072_v9 = vld [vmem:[%s5016_s5 + $0xd0] sm:$0xff] }
 0x458   :  { %v1117_v18 = vld [vmem:[%s5016_s5 + $0x238] sm:$0xff]  ;;  %v1114_v28 = vld [vmem:[%s5016_s5 + $0x220] sm:$0xff] }
 0x459   :  { %v4205_v34 = vadd.f32 %v1036_v26, %v1023_v30  ;;  %v1044_v4 = vmax.f32 %v1041_v33, 0.0  ;;  %v1069_v26 = vld [vmem:[%s5016_s5 + $0xb8] sm:$0xff]  ;;  %v1066_v30 = vld [vmem:[%s5016_s5 + $0xa0] sm:$0xff]  ;;  %v1111_v33 = vld [vmem:[%s5016_s5 + $0x208] sm:$0xff] }
 0x45b   :  { %v1045_v36 = vmax.f32 %v4205_v34, 0.0  ;;  %1238 = vmatprep.mubr.f32.mxu0 %v1044_v4 }
 0x45c   :  { %1239 = vmatmul.mubr.f32.vlgmr.msra.gmra.mxu0 %v1043_v35 }
 0x45d   :  { %2847 = vmatmul.mubr.msk.f32.vlgmr.msra.gmra.mxu1 %vm377_vm4, %v1045_v36  ;;  %3195 = vmatprep.mubr.msk.f32.mxu0 %vm3280_vm0, %v5029_v16 }
 0x45e   :  { %2984 = vmatpush3.msra.mxu1 %v1093_v11  ;;  %1380 = vmatprep.mubr.f32.mxu1 %v1044_v4  ;;  %v1063_v4 = vld [vmem:[%s5016_s5 + $0x88] sm:$0xff]  ;;  %v1108_v11 = vld [vmem:[%s5016_s5 + $0x1f0] sm:$0xff] }
 0x45f   :  { %2985 = vmatprep.subr.mxu1 %v1138_v5  ;;  %v1060_v5 = vld [vmem:[%s5016_s5 + $0x70] sm:$0xff] }
 0x460   :  { %2986 = vmatpush3.msra.mxu1 %v1090_v37  ;;  %v1105_v37 = vld [vmem:[%s5016_s5 + $0x1d8] sm:$0xff] }
 0x461   :  { %2987 = vmatprep.subr.mxu1 %v1135_v38  ;;  %v1057_v38 = vld [vmem:[%s5016_s5 + $0x58] sm:$0xff] }
 0x462   :  { %2988 = vmatpush3.msra.mxu1 %v1087_v2  ;;  %v1102_v2 = vld [vmem:[%s5016_s5 + $0x1c0] sm:$0xff] }
 0x463   :  { %2989 = vmatprep.subr.mxu1 %v1132_v39  ;;  %v1054_v39 = vld [vmem:[%s5016_s5 + $0x40] sm:$0xff] }
 0x464   :  { %2990 = vmatpush3.msra.mxu1 %v1084_v32  ;;  %v1099_v32 = vld [vmem:[%s5016_s5 + $0x1a8] sm:$0xff] }
 0x465   :  { %2991 = vmatprep.subr.mxu1 %v1129_v40  ;;  %v1051_v40 = vld [vmem:[%s5016_s5 + $0x28] sm:$0xff] }
 0x466   :  { %2992 = vmatpush3.msra.mxu1 %v1081_v24  ;;  %v1096_v24 = vld [vmem:[%s5016_s5 + $0x190] sm:$0xff] }
 0x467   :  { %2993 = vmatprep.subr.mxu1 %v1126_v41  ;;  %v1048_v41 = vld [vmem:[%s5016_s5 + $0x10] sm:$0xff] }
 0x468   :  { %2994 = vmatpush3.msra.mxu1 %v1078_v42  ;;  %v1144_v42 = vld [vmem:[%s5016_s5 + $0x310] sm:$0xf] }
 0x469   :  { %2995 = vmatprep.subr.mxu1 %v1123_v3 }
 0x46a   :  { %2996 = vmatpush3.msra.mxu1 %v1075_v7 }
 0x46b   :  { %2997 = vmatprep.subr.mxu1 %v1120_v8 }
 0x46c   :  { %2998 = vmatpush3.msra.mxu1 %v1072_v9 }
 0x46d   :  { %2999 = vmatprep.subr.mxu1 %v1117_v18 }
 0x46e   :  { %3000 = vmatpush3.msra.mxu1 %v1069_v26 }
 0x46f   :  { %3001 = vmatprep.subr.mxu1 %v1114_v28 }
 0x470   :  { %3002 = vmatpush3.msra.mxu1 %v1066_v30 }
 0x471   :  { %3003 = vmatprep.subr.mxu1 %v1111_v33 }
 0x472   :  { %3004 = vmatpush3.msra.mxu1 %v1063_v4 }
 0x473   :  { %3005 = vmatprep.subr.mxu1 %v1108_v11 }
 0x474   :  { %3006 = vmatpush3.msra.mxu1 %v1060_v5  ;;  %v4389_v5 = vld [vmem:[%s5025_s14 + $0x8] sm:$0xf] }
 0x475   :  { %3007 = vmatprep.subr.mxu1 %v1105_v37  ;;  %v3224_v37 = vld [vmem:[%s5024_s13 + $0xf8] sm:$0xff] }
 0x476   :  { %3008 = vmatpush3.msra.mxu1 %v1057_v38  ;;  %v3225_v38 = vld [vmem:[%s5024_s13 + $0x78] sm:$0xff] }
 0x477   :  { %3009 = vmatprep.subr.mxu1 %v1102_v2  ;;  %v3226_v2 = vld [vmem:[%s5024_s13 + $0xf0] sm:$0xff] }
 0x478   :  { %3010 = vmatpush3.msra.mxu1 %v1054_v39  ;;  %v3227_v39 = vld [vmem:[%s5024_s13 + $0x70] sm:$0xff] }
 0x479   :  { %3011 = vmatprep.subr.mxu1 %v1099_v32  ;;  %v3228_v32 = vld [vmem:[%s5024_s13 + $0xe8] sm:$0xff] }
 0x47a   :  { %3012 = vmatpush3.msra.mxu1 %v1051_v40  ;;  %v3229_v40 = vld [vmem:[%s5024_s13 + $0x68] sm:$0xff] }
 0x47b   :  { %3013 = vmatprep.subr.mxu1 %v1096_v24  ;;  %v3230_v24 = vld [vmem:[%s5024_s13 + $0xe0] sm:$0xff] }
 0x47c   :  { %3014 = vmatpush3.msra.mxu1 %v1048_v41  ;;  %v3231_v41 = vld [vmem:[%s5024_s13 + $0x60] sm:$0xff] }
 0x47d   :  { %1381 = vmatmul.mubr.f32.vlgmr.msra.gmra.mxu1 %v1043_v35  ;;  %3188 = vmatprep.subr.mxu1 %v5029_v16 }
 0x47e   :  { %3189 = vmatpush3.msk.msra.mxu1 %vm381_vm3, %v1144_v42  ;;  %3190 = vmatprep.mubr.msk.f32.mxu1 %vm3280_vm0, %v5029_v16  ;;  %v3232_v42 = vld [vmem:[%s5024_s13 + $0xd8] sm:$0xff] }
 0x47f   :  { %3020 = vmatprep.subr.mxu1 %v3606_v15  ;;  %v1488_v15 = vld [vmem:[%s5024_s13 + $0x100] sm:$0xff] }
 0x480   :  { %3194 = vmatpush3.msra.mxu0 %v1488_v15 }
 0x481   :  { %3191 = vmatmul.mubr.msk.f32.vlgmr.msra.gmra.mxu1 %vm377_vm4, %v1045_v36  ;;  %2851 = vmatprep.subr.msk.mxu0 %vm381_vm3, %v3898_v22 }
 0x482   :  { %3021 = vmatpush3.msra.mxu1 %v3615_v17  ;;  %v1145_v17 = vld [vmem:[%s5017_s6] sm:$0x7] }
 0x483   :  { %3022 = vmatprep.subr.mxu1 %v3624_v19  ;;  %v1150_v19 = vrot.slane %v1145_v17, %v3865_v12 }
 0x484   :  { %3023 = vmatpush3.msra.mxu1 %v3633_v21  ;;  %v1154_v21 = vrot.slane %v1145_v17, %v3869_v14 }
 0x485   :  { %3024 = vmatprep.subr.mxu1 %v3642_v23 }
 0x486   :  { %3025 = vmatpush3.msra.mxu1 %v3651_v25 }
 0x487   :  { %3026 = vmatprep.subr.mxu1 %v3660_v27 }
 0x488   :  { %3027 = vmatpush3.msra.mxu1 %v3669_v29 }
 0x489   :  { %3028 = vmatprep.subr.mxu1 %v3678_v31 }
 0x48a   :  { %3029 = vmatpush3.msra.mxu1 %v3720_v43 }
 0x48b   :  { %3030 = vmatprep.subr.mxu1 %v3725_v44 }
 0x48c   :  { %3031 = vmatpush3.msra.mxu1 %v3732_v45 }
 0x48d   :  { %3032 = vmatprep.subr.mxu1 %v3737_v46 }
 0x48e   :  { %3033 = vmatpush3.msra.mxu1 %v3742_v47 }
 0x48f   :  { %3034 = vmatprep.subr.mxu1 %v3750_v48 }
 0x490   :  { %3035 = vmatpush3.msra.mxu1 %v3756_v49 }
 0x491   :  { %3036 = vmatprep.subr.mxu1 %v3762_v50 }
 0x492   :  { %3037 = vmatpush3.msra.mxu1 %v3768_v51 }
 0x493   :  { %3038 = vmatprep.subr.mxu1 %v3774_v52 }
 0x494   :  { %3039 = vmatpush3.msra.mxu1 %v3780_v53 }
 0x495   :  { %3040 = vmatprep.subr.mxu1 %v3786_v54 }
 0x496   :  { %3041 = vmatpush3.msra.mxu1 %v3792_v55 }
 0x497   :  { %3042 = vmatprep.subr.mxu1 %v3798_v56 }
 0x498   :  { %3043 = vmatpush3.msra.mxu1 %v3804_v57 }
 0x499   :  { %3044 = vmatprep.subr.mxu1 %v3810_v58 }
 0x49a   :  { %3045 = vmatpush3.msra.mxu1 %v3816_v59 }
 0x49b   :  { %3046 = vmatprep.subr.mxu1 %v3822_v60 }
 0x49c   :  { %3047 = vmatpush3.msra.mxu1 %v3827_v61  ;;  %v1158_v61 = vrot.slane %v1145_v17, %v3859_v6  ;;  %v3234_v17 = vld [vmem:[%s5024_s13 + $0xd0] sm:$0xff] }
 0x49d   :  { %3048 = vmatprep.subr.mxu1 %v3832_v62 }
 0x49e   :  { %3049 = vmatpush3.msra.mxu1 %v3838_v63 }
 0x49f   :  { %3050 = vmatprep.subr.mxu1 %v3844_v0 }
 0x4a0   :  { %3051 = vmatpush3.msra.mxu1 %v3850_v1 }
 0x4a1   :  { %3203 = vmatprep.subr.mxu1 %v5029_v16 }
 0x51c   :  { %v1240_v23 = vpop.f32.mrf.mxu0 }
 0x51d   :  { %v1241_v25 = vadd.f32 %v1240_v23, %v1150_v19  ;;  %v1311_v27 = vpop.f32.mrf.mxu1  ;;  %v3235_v19 = vld [vmem:[%s5024_s13 + $0x50] sm:$0xff]  ;;  %v3237_v23 = vld [vmem:[%s5024_s13 + $0x48] sm:$0xff] }
 0x51e   :  { %v1242_v29 = vpop.f32.mrf.mxu0 }
 0x51f   :  { %v4364_v31 = vadd.f32 %v1311_v27, %v1241_v25  ;;  %v1243_v43 = vadd.f32 %v1242_v29, %v1154_v21  ;;  %v1313_v44 = vpop.f32.mrf.mxu1  ;;  %v3236_v21 = vld [vmem:[%s5024_s13 + $0xc8] sm:$0xff]  ;;  %v3238_v25 = vld [vmem:[%s5024_s13 + $0xc0] sm:$0xff]  ;;  %v3240_v29 = vld [vmem:[%s5024_s13 + $0xb8] sm:$0xff] }
 0x520   :  { %v3239_v27 = vld [vmem:[%s5024_s13 + $0x40] sm:$0xff] }
 0x521   :  { %v1493_v45 = vsel %vm354_vm2, %v4364_v31, 0.0  ;;  %v4368_v46 = vadd.f32 %v1313_v44, %v1243_v43  ;;  %v3241_v43 = vld [vmem:[%s5024_s13 + $0x38] sm:$0xff]  ;;  %v3242_v44 = vld [vmem:[%s5024_s13 + $0xb0] sm:$0xff] }
 0x522   :  { %v1494_v47 = vrot.slane %v1493_v45, 4 }
 0x523   :  { %v1500_v48 = vsel %vm354_vm2, %v4368_v46, 0.0 }
 0x524   :  { %v1495_v49 = vadd.f32 %v1494_v47, %v1493_v45  ;;  %v1501_v50 = vrot.slane %v1500_v48, 4  ;;  %v3243_v45 = vld [vmem:[%s5024_s13 + $0x30] sm:$0xff]  ;;  %v3244_v47 = vld [vmem:[%s5024_s13 + $0xa8] sm:$0xff] }
 0x526   :  { %v1496_v51 = vrot.slane %v1495_v49, 2  ;;  %v1502_v52 = vadd.f32 %v1501_v50, %v1500_v48  ;;  %v3245_v48 = vld [vmem:[%s5024_s13 + $0x28] sm:$0xff]  ;;  %v3247_v50 = vld [vmem:[%s5024_s13 + $0x20] sm:$0xff] }
 0x528   :  { %v1497_v53 = vadd.f32 %v1496_v51, %v1495_v49  ;;  %v1503_v54 = vrot.slane %v1502_v52, 2  ;;  %v3246_v49 = vld [vmem:[%s5024_s13 + $0xa0] sm:$0xff]  ;;  %v3248_v51 = vld [vmem:[%s5024_s13 + $0x98] sm:$0xff] }
 0x52a   :  { %v1504_v55 = vadd.f32 %v1503_v54, %v1502_v52  ;;  %v1498_v56 = vrot.slane %v1497_v53, 1  ;;  %v3249_v52 = vld [vmem:[%s5024_s13 + $0x18] sm:$0xff]  ;;  %v3251_v54 = vld [vmem:[%s5024_s13 + $0x10] sm:$0xff] }
 0x52c   :  { %v1505_v57 = vrot.slane %v1504_v55, 1  ;;  %v1499_v59 = vadd.f32 %v1498_v56, %v1497_v53  ;;  %v3250_v53 = vld [vmem:[%s5024_s13 + $0x90] sm:$0xff]  ;;  %v3253_v56 = vld [vmem:[%s5024_s13 + $0x8] sm:$0xff] }
 0x52e   :  { %v1506_v58 = vadd.f32 %v1505_v57, %v1504_v55  ;;  %v3252_v55 = vld [vmem:[%s5024_s13 + $0x88] sm:$0xff]  ;;  %v3254_v57 = vld [vmem:[%s5024_s13 + $0x80] sm:$0xff] }
 0x530   :  { %1583 = vmatprep.mubr.f32.mxu1 %v1506_v58  ;;  %v3255_v58 = vld [vmem:[%s5024_s13] sm:$0xff] }
 0x531   :  { %1584 = vmatmul.mubr.f32.vlgmr.msra.gmra.mxu1 %v1499_v59 }
 0x532   :  { %3204 = vmatpush3.msra.mxu1 %v1488_v15  ;;  %3205 = vmatprep.mubr.msk.f32.mxu1 %vm3280_vm0, %v5029_v16  ;;  %v3233_v15 = vld [vmem:[%s5024_s13 + $0x58] sm:$0xff] }
 0x533   :  { %2857 = vmatprep.subr.msk.mxu1 %vm381_vm3, %v3898_v22 }
 0x53d   :  { %v3015_v60 = vpop.f32.mrf.mxu1 }
 0x53f   :  { %v3016_v62 = vpop.f32.mrf.mxu1 }
 0x540   :  { %v3017_v63 = vadd.f32 %v3016_v62, %v3015_v60 }
 0x541   :  { %v1452_v0 = vpop.f32.mrf.mxu1 }
 0x542   :  { %v1383_v1 = vadd.f32 %v3017_v63, %v1158_v61 }
 0x543   :  { %v3192_v13 = vpop.f32.mrf.mxu1 }
 0x544   :  { %v4377_v34 = vadd.f32 %v1452_v0, %v1383_v1 }
 0x546   :  { %v1508_v35 = vsel %vm1507_vm5, %v4377_v34, 0.0 }
 0x547   :  { %v1509_v36 = vrot.slane %v1508_v35, 4 }
 0x549   :  { %v1510_v3 = vadd.f32 %v1509_v36, %v1508_v35 }
 0x54b   :  { %v1511_v7 = vrot.slane %v1510_v3, 2 }
 0x54d   :  { %v1512_v8 = vadd.f32 %v1511_v7, %v1510_v3 }
 0x54f   :  { %v1513_v9 = vrot.slane %v1512_v8, 1 }
 0x551   :  { %v1514_v22 = vadd.f32 %v1513_v9, %v1512_v8 }
 0x553   :  { %3196 = vmatmul.mubr.msk.f32.vlgmr.msra.gmra.mxu0 %vm1515_vm6, %v1514_v22 }
 0x554   :  { %2852 = vmatpush1.msk.msra.mxu0 %vm381_vm3, %v3894_v20  ;;  %1736 = vmatprep.mubr.f32.mxu0 %v5029_v16 }
 0x555   :  { %3198 = vmatprep.subr.mxu0 %v5029_v16 }
 0x5f1   :  { %v3052_v18 = vpop.f32.mrf.mxu1 }
 0x5f3   :  { %v3053_v26 = vpop.f32.mrf.mxu1 }
 0x5f4   :  { %v3054_v28 = vadd.f32 %v3053_v26, %v3052_v18 }
 0x613   :  { %v1655_v30 = vpop.f32.mrf.mxu0 }
 0x614   :  { %v1656_v33 = vadd.f32 %v3054_v28, %v1655_v30 }
 0x615   :  { %v3197_v4 = vpop.f32.mrf.mxu0 }
 0x616   :  { %v1659_v11 = vmul.f32 0.007575758, %v1656_v33 }
 0x618   :  { %2853 = vmatmul.mubr.msk.f32.vlgmr.msra.gmra.mxu0 %vm377_vm4, %v1659_v11 }
 0x619   :  { %3199 = vmatpush3.msk.msra.mxu0 %vm381_vm3, %v4389_v5  ;;  %3200 = vmatprep.mubr.msk.f32.mxu0 %vm3280_vm0, %v5029_v16 }
 0x61a   :  { %3059 = vmatprep.subr.mxu0 %v3224_v37 }
 0x61c   :  { %3201 = vmatmul.mubr.msk.f32.vlgmr.msra.gmra.mxu0 %vm377_vm4, %v1659_v11 }
 0x61d   :  { %3060 = vmatpush3.msra.mxu0 %v3225_v38 }
 0x61e   :  { %3061 = vmatprep.subr.mxu0 %v3226_v2 }
 0x61f   :  { %3062 = vmatpush3.msra.mxu0 %v3227_v39 }
 0x620   :  { %3063 = vmatprep.subr.mxu0 %v3228_v32 }
 0x621   :  { %3064 = vmatpush3.msra.mxu0 %v3229_v40 }
 0x622   :  { %3065 = vmatprep.subr.mxu0 %v3230_v24 }
 0x623   :  { %3066 = vmatpush3.msra.mxu0 %v3231_v41 }
 0x624   :  { %3067 = vmatprep.subr.mxu0 %v3232_v42 }
 0x625   :  { %3068 = vmatpush3.msra.mxu0 %v3233_v15 }
 0x626   :  { %3069 = vmatprep.subr.mxu0 %v3234_v17 }
 0x627   :  { %3070 = vmatpush3.msra.mxu0 %v3235_v19 }
 0x628   :  { %3071 = vmatprep.subr.mxu0 %v3236_v21 }
 0x629   :  { %3072 = vmatpush3.msra.mxu0 %v3237_v23 }
 0x62a   :  { %3073 = vmatprep.subr.mxu0 %v3238_v25 }
 0x62b   :  { %3074 = vmatpush3.msra.mxu0 %v3239_v27 }
 0x62c   :  { %3075 = vmatprep.subr.mxu0 %v3240_v29 }
 0x62d   :  { %3076 = vmatpush3.msra.mxu0 %v3241_v43  ;;  %v1491_v43 = vld [vmem:[%s5018_s7] sm:$0x1] }
 0x62e   :  { %3077 = vmatprep.subr.mxu0 %v3242_v44 }
 0x62f   :  { %3078 = vmatpush3.msra.mxu0 %v3243_v45 }
 0x630   :  { %3079 = vmatprep.subr.mxu0 %v3244_v47  ;;  %v2210_v47 = vld [vmem:[%s5020_s9 + $0xf0] sm:$0xff] }
 0x631   :  { %3080 = vmatpush3.msra.mxu0 %v3245_v48  ;;  %v2209_v48 = vld [vmem:[%s5020_s9 + $0xe8] sm:$0xff] }
 0x632   :  { %3081 = vmatprep.subr.mxu0 %v3246_v49  ;;  %v2208_v49 = vld [vmem:[%s5020_s9 + $0xe0] sm:$0xff] }
 0x633   :  { %3082 = vmatpush3.msra.mxu0 %v3247_v50  ;;  %v2206_v50 = vld [vmem:[%s5020_s9 + $0xd0] sm:$0xff] }
 0x634   :  { %3083 = vmatprep.subr.mxu0 %v3248_v51  ;;  %v2205_v51 = vld [vmem:[%s5020_s9 + $0xc8] sm:$0xff] }
 0x635   :  { %3084 = vmatpush3.msra.mxu0 %v3249_v52  ;;  %v2204_v52 = vld [vmem:[%s5020_s9 + $0xc0] sm:$0xff] }
 0x636   :  { %3085 = vmatprep.subr.mxu0 %v3250_v53  ;;  %v2203_v53 = vld [vmem:[%s5020_s9 + $0xb8] sm:$0xff] }
 0x637   :  { %3086 = vmatpush3.msra.mxu0 %v3251_v54  ;;  %v2202_v54 = vld [vmem:[%s5020_s9 + $0xb0] sm:$0xff] }
 0x638   :  { %3087 = vmatprep.subr.mxu0 %v3252_v55  ;;  %v2201_v55 = vld [vmem:[%s5020_s9 + $0xa8] sm:$0xff] }
 0x639   :  { %3088 = vmatpush3.msra.mxu0 %v3253_v56  ;;  %v2200_v56 = vld [vmem:[%s5020_s9 + $0xa0] sm:$0xff] }
 0x63a   :  { %3089 = vmatprep.subr.mxu0 %v3254_v57  ;;  %v2199_v57 = vld [vmem:[%s5020_s9 + $0x98] sm:$0xff] }
 0x63b   :  { %3090 = vmatpush3.msra.mxu0 %v3255_v58  ;;  %v2198_v58 = vld [vmem:[%s5020_s9 + $0x90] sm:$0xff] }
 0x6d8   :  { %v1738_v59 = vpop.f32.mrf.mxu0 }
 0x6d9   :  { %v1816_v60 = vrot.slane %v1738_v59, %v3865_v12  ;;  %v2197_v59 = vld [vmem:[%s5020_s9 + $0x88] sm:$0xff] }
 0x6da   :  { %v1740_v61 = vpop.f32.mrf.mxu0 }
 0x6db   :  { %v4495_v62 = vsub.f32 %v4364_v31, %v1816_v60  ;;  %v1820_v63 = vrot.slane %v1740_v61, %v3865_v12  ;;  %v2196_v60 = vld [vmem:[%s5020_s9 + $0x80] sm:$0xff]  ;;  %v2195_v61 = vld [vmem:[%s5020_s9 + $0x78] sm:$0xff] }
 0x6dc   :  { %v1809_v0 = vpop.f32.mrf.mxu0 }
 0x6dd   :  { %v1828_v1 = vmul.f32 %v4495_v62, %v4495_v62  ;;  %v4501_v13 = vsub.f32 %v4368_v46, %v1820_v63  ;;  %v1824_v35 = vrot.slane %v1809_v0, %v3865_v12  ;;  %v2194_v63 = vld [vmem:[%s5020_s9 + $0x70] sm:$0xff]  ;;  %v2193_v0 = vld [vmem:[%s5020_s9 + $0x68] sm:$0xff] }
 0x6de   :  { %v3202_v36 = vpop.f32.mrf.mxu0 }
 0x6df   :  { %v1831_v3 = vsel %vm354_vm2, %v1828_v1, 0.0  ;;  %v1829_v7 = vmul.f32 %v4501_v13, %v4501_v13  ;;  %v4508_v31 = vsub.f32 %v4377_v34, %v1824_v35  ;;  %v2192_v1 = vld [vmem:[%s5020_s9 + $0x60] sm:$0xff]  ;;  %v2191_v35 = vld [vmem:[%s5020_s9 + $0x58] sm:$0xff]  ;;  %v2190_v36 = vld [vmem:[%s5020_s9 + $0x50] sm:$0xff] }
 0x6e0   :  { %v1832_v8 = vrot.slane %v1831_v3, 4 }
 0x6e1   :  { %v1838_v9 = vsel %vm354_vm2, %v1829_v7, 0.0  ;;  %v1830_v22 = vmul.f32 %v4508_v31, %v4508_v31  ;;  %v2188_v7 = vld [vmem:[%s5020_s9 + $0x40] sm:$0xff] }
 0x6e2   :  { %v1833_v18 = vadd.f32 %v1832_v8, %v1831_v3  ;;  %v1839_v46 = vrot.slane %v1838_v9, 4  ;;  %v2189_v3 = vld [vmem:[%s5020_s9 + $0x48] sm:$0xff]  ;;  %v2187_v8 = vld [vmem:[%s5020_s9 + $0x38] sm:$0xff] }
 0x6e3   :  { %v1845_v26 = vsel %vm1507_vm5, %v1830_v22, 0.0  ;;  %v2185_v22 = vld [vmem:[%s5020_s9 + $0x28] sm:$0xff] }
 0x6e4   :  { %v1834_v28 = vrot.slane %v1833_v18, 2  ;;  %v1840_v30 = vadd.f32 %v1839_v46, %v1838_v9  ;;  %v1846_v33 = vrot.slane %v1845_v26, 4  ;;  %v2186_v9 = vld [vmem:[%s5020_s9 + $0x30] sm:$0xff]  ;;  %v2183_v46 = vld [vmem:[%s5020_s9 + $0x18] sm:$0xff] }
 0x6e6   :  { %v1847_v4 = vadd.f32 %v1846_v33, %v1845_v26  ;;  %v1841_v11 = vrot.slane %v1840_v30, 2  ;;  %v1835_v37 = vadd.f32 %v1834_v28, %v1833_v18  ;;  %v2184_v18 = vld [vmem:[%s5020_s9 + $0x20] sm:$0xff]  ;;  %v2182_v26 = vld [vmem:[%s5020_s9 + $0x10] sm:$0xff]  ;;  %v2181_v28 = vld [vmem:[%s5020_s9 + $0x8] sm:$0xff] }
 0x6e7   :  { %v2243_v33 = vld [vmem:[%s5020_s9 + $0x1f8] sm:$0xff] }
 0x6e8   :  { %v1848_v38 = vrot.slane %v1847_v4, 2  ;;  %v1842_v2 = vadd.f32 %v1841_v11, %v1840_v30  ;;  %v1836_v34 = vrot.slane %v1835_v37, 1  ;;  %v2180_v30 = vld [vmem:[%s5020_s9] sm:$0xff]  ;;  %v2241_v11 = vld [vmem:[%s5020_s9 + $0x1e8] sm:$0xff] }
 0x6ea   :  { %v1849_v39 = vadd.f32 %v1848_v38, %v1847_v4  ;;  %v1843_v32 = vrot.slane %v1842_v2, 1  ;;  %v1837_v41 = vadd.f32 %v1836_v34, %v1835_v37  ;;  %v2242_v4 = vld [vmem:[%s5020_s9 + $0x1f0] sm:$0xff]  ;;  %v2240_v37 = vld [vmem:[%s5020_s9 + $0x1e0] sm:$0xff]  ;;  %v2239_v38 = vld [vmem:[%s5020_s9 + $0x1d8] sm:$0xff] }
 0x6eb   :  { %v2237_v34 = vld [vmem:[%s5020_s9 + $0x1c8] sm:$0xff] }
 0x6ec   :  { %v1850_v40 = vrot.slane %v1849_v39, 1  ;;  %v1844_v24 = vadd.f32 %v1843_v32, %v1842_v2  ;;  %v2238_v2 = vld [vmem:[%s5020_s9 + $0x1d0] sm:$0xff]  ;;  %v2235_v32 = vld [vmem:[%s5020_s9 + $0x1b8] sm:$0xff] }
 0x6ee   :  { %v1851_v42 = vadd.f32 %v1850_v40, %v1849_v39  ;;  %1919 = vmatprep.mubr.f32.mxu0 %v1844_v24  ;;  %v2236_v39 = vld [vmem:[%s5020_s9 + $0x1c0] sm:$0xff]  ;;  %v2234_v40 = vld [vmem:[%s5020_s9 + $0x1b0] sm:$0xff]  ;;  %v2233_v24 = vld [vmem:[%s5020_s9 + $0x1a8] sm:$0xff] }
 0x6ef   :  { %1920 = vmatmul.mubr.f32.vlgmr.msra.gmra.mxu0 %v1837_v41  ;;  %v2232_v41 = vld [vmem:[%s5020_s9 + $0x1a0] sm:$0xff] }
 0x6f0   :  { %3206 = vmatmul.mubr.msk.f32.vlgmr.msra.gmra.mxu1 %vm1515_vm6, %v1851_v42  ;;  %2396 = vmatprep.mubr.f32.mxu0 %v5029_v16  ;;  %v2231_v42 = vld [vmem:[%s5020_s9 + $0x198] sm:$0xff] }
 0x6f1   :  { %2858 = vmatpush1.msk.msra.mxu1 %vm381_vm3, %v3894_v20  ;;  %2066 = vmatprep.mubr.f32.mxu1 %v5029_v16  ;;  %v2211_v20 = vld [vmem:[%s5020_s9 + $0xf8] sm:$0xff] }
 0x6f2   :  { %3208 = vmatprep.subr.mxu1 %v5029_v16 }
 0x7af   :  { %v3091_v15 = vpop.f32.mrf.mxu0 }
 0x7b0   :  { %v1991_v17 = vpop.f32.mrf.mxu1 }
 0x7b1   :  { %v3092_v19 = vpop.f32.mrf.mxu0 }
 0x7b2   :  { %v3093_v21 = vadd.f32 %v3092_v19, %v3091_v15  ;;  %v3207_v23 = vpop.f32.mrf.mxu1  ;;  %v2230_v15 = vld [vmem:[%s5020_s9 + $0x190] sm:$0xff]  ;;  %v2228_v19 = vld [vmem:[%s5020_s9 + $0x180] sm:$0xff] }
 0x7b3   :  { %v2226_v23 = vld [vmem:[%s5020_s9 + $0x170] sm:$0xff] }
 0x7b4   :  { %v1992_v25 = vadd.f32 %v3093_v21, %v1991_v17  ;;  %v2229_v17 = vld [vmem:[%s5020_s9 + $0x188] sm:$0xff]  ;;  %v2227_v21 = vld [vmem:[%s5020_s9 + $0x178] sm:$0xff] }
 0x7b6   :  { %v1995_v27 = vmul.f32 0.007575758, %v1992_v25  ;;  %v2225_v25 = vld [vmem:[%s5020_s9 + $0x168] sm:$0xff] }
 0x7b8   :  { %v1996_v29 = vadd.f32 1e-05, %v1995_v27  ;;  %v2224_v27 = vld [vmem:[%s5020_s9 + $0x160] sm:$0xff] }
 0x7ba   :  { %3220 = vrsqrt.f32 %v1996_v29  ;;  %v2223_v29 = vld [vmem:[%s5020_s9 + $0x158] sm:$0xff] }
 0x7c7   :  { %v3221_v44 = vpop.eup %3220 }
 0x7c8   :  { %v1998_v45 = vmul.f32 %v3221_v44, %v1491_v43  ;;  %v2222_v43 = vld [vmem:[%s5020_s9 + $0x150] sm:$0xff]  ;;  %v2221_v44 = vld [vmem:[%s5020_s9 + $0x148] sm:$0xff] }
 0x7ca   :  { %2859 = vmatmul.mubr.msk.f32.vlgmr.msra.gmra.mxu1 %vm377_vm4, %v1998_v45 }
 0x7cb   :  { %3209 = vmatpush3.msk.msra.mxu1 %vm381_vm3, %v4389_v5  ;;  %3210 = vmatprep.mubr.msk.f32.mxu1 %vm3280_vm0, %v5029_v16  ;;  %v2207_v5 = vld [vmem:[%s5020_s9 + $0xd8] sm:$0xff] }
 0x7cc   :  { %2261 = vmatprep.subr.mxu1 %v2211_v20  ;;  %v2219_v20 = vld [vmem:[%s5020_s9 + $0x138] sm:$0xff] }
 0x7ce   :  { %3211 = vmatmul.mubr.msk.f32.vlgmr.msra.gmra.mxu1 %vm377_vm4, %v1998_v45  ;;  %v2220_v45 = vld [vmem:[%s5020_s9 + $0x140] sm:$0xff] }
 0x7cf   :  { %2262 = vmatpush1.msra.mxu1 %v2210_v47  ;;  %v2218_v47 = vld [vmem:[%s5020_s9 + $0x130] sm:$0xff] }
 0x7d0   :  { %2263 = vmatprep.subr.mxu1 %v2209_v48  ;;  %v2217_v48 = vld [vmem:[%s5020_s9 + $0x128] sm:$0xff] }
 0x7d1   :  { %2264 = vmatpush1.msra.mxu1 %v2208_v49  ;;  %v2216_v49 = vld [vmem:[%s5020_s9 + $0x120] sm:$0xff] }
 0x7d2   :  { %2265 = vmatprep.subr.mxu1 %v2207_v5  ;;  %v2215_v5 = vld [vmem:[%s5020_s9 + $0x118] sm:$0xff] }
 0x7d3   :  { %2266 = vmatpush1.msra.mxu1 %v2206_v50  ;;  %v2214_v50 = vld [vmem:[%s5020_s9 + $0x110] sm:$0xff] }
 0x7d4   :  { %2267 = vmatprep.subr.mxu1 %v2205_v51  ;;  %v2213_v51 = vld [vmem:[%s5020_s9 + $0x108] sm:$0xff] }
 0x7d5   :  { %2268 = vmatpush1.msra.mxu1 %v2204_v52  ;;  %v2245_v52 = vld [vmem:[%s5020_s9 + $0x208] sm:$0xff] }
 0x7d6   :  { %2269 = vmatprep.subr.mxu1 %v2203_v53  ;;  %v2212_v53 = vld [vmem:[%s5020_s9 + $0x100] sm:$0xff]  ;;  %2362 = vmatprep.subr.mxu0 %v2245_v52 }
 0x7d7   :  { %2270 = vmatpush1.msra.mxu1 %v2202_v54  ;;  %v2244_v54 = vld [vmem:[%s5020_s9 + $0x200] sm:$0xff] }
 0x7d8   :  { %2271 = vmatprep.subr.mxu1 %v2201_v55  ;;  %2363 = vmatpush1.msra.mxu0 %v2244_v54  ;;  %v4730_v55 = vld [vmem:[%s5024_s13 + $0xf8] sm:$0xff] }
 0x7d9   :  { %2272 = vmatpush1.msra.mxu1 %v2200_v56  ;;  %3098 = vmatprep.subr.mxu0 %v4730_v55  ;;  %v1492_v56 = vld [vmem:[%s5019_s8] sm:$0x7] }
 0x7da   :  { %2273 = vmatprep.subr.mxu1 %v2199_v57 }
 0x7db   :  { %2274 = vmatpush1.msra.mxu1 %v2198_v58 }
 0x7dc   :  { %2275 = vmatprep.subr.mxu1 %v2197_v59  ;;  %v2162_v59 = vrot.slane %v1492_v56, %v3865_v12 }
 0x7dd   :  { %2276 = vmatpush1.msra.mxu1 %v2196_v60 }
 0x7de   :  { %2277 = vmatprep.subr.mxu1 %v2195_v61 }
 0x7df   :  { %2278 = vmatpush1.msra.mxu1 %v2194_v63 }
 0x7e0   :  { %2279 = vmatprep.subr.mxu1 %v2193_v0  ;;  %v2166_v0 = vrot.slane %v1492_v56, %v3869_v14 }
 0x7e1   :  { %2280 = vmatpush1.msra.mxu1 %v2192_v1 }
 0x7e2   :  { %2281 = vmatprep.subr.mxu1 %v2191_v35 }
 0x7e3   :  { %2282 = vmatpush1.msra.mxu1 %v2190_v36 }
 0x7e4   :  { %2283 = vmatprep.subr.mxu1 %v2189_v3  ;;  %v2170_v3 = vrot.slane %v1492_v56, %v3859_v6  ;;  %v4753_v6 = vld [vmem:[%s5024_s13 + $0xf0] sm:$0xff] }
 0x7e5   :  { %2284 = vmatpush1.msra.mxu1 %v2188_v7 }
 0x7e6   :  { %2285 = vmatprep.subr.mxu1 %v2187_v8 }
 0x7e7   :  { %2286 = vmatpush1.msra.mxu1 %v2186_v9 }
 0x7e8   :  { %2287 = vmatprep.subr.mxu1 %v2185_v22 }
 0x7e9   :  { %2288 = vmatpush1.msra.mxu1 %v2184_v18 }
 0x7ea   :  { %2289 = vmatprep.subr.mxu1 %v2183_v46 }
 0x7eb   :  { %2290 = vmatpush1.msra.mxu1 %v2182_v26 }
 0x7ec   :  { %2291 = vmatprep.subr.mxu1 %v2181_v28  ;;  %v4748_v28 = vld [vmem:[%s5024_s13 + $0x78] sm:$0xff] }
 0x7ed   :  { %2292 = vmatpush1.msra.mxu1 %v2180_v30  ;;  %v4772_v30 = vld [vmem:[%s5024_s13 + $0x68] sm:$0xff] }
 0x7ee   :  { %2293 = vmatprep.subr.mxu1 %v2243_v33  ;;  %v4778_v33 = vld [vmem:[%s5024_s13 + $0xe0] sm:$0xff] }
 0x7ef   :  { %2294 = vmatpush2.msra.mxu1 %v2242_v4  ;;  %v4784_v4 = vld [vmem:[%s5024_s13 + $0x60] sm:$0xff] }
 0x7f0   :  { %2295 = vmatprep.subr.mxu1 %v2241_v11  ;;  %v4790_v11 = vld [vmem:[%s5024_s13 + $0xd8] sm:$0xff] }
 0x7f1   :  { %2296 = vmatpush2.msra.mxu1 %v2240_v37  ;;  %v4796_v37 = vld [vmem:[%s5024_s13 + $0x58] sm:$0xff] }
 0x7f2   :  { %2297 = vmatprep.subr.mxu1 %v2239_v38  ;;  %v4802_v38 = vld [vmem:[%s5024_s13 + $0xd0] sm:$0xff] }
 0x7f3   :  { %2298 = vmatpush2.msra.mxu1 %v2238_v2  ;;  %v4810_v2 = vld [vmem:[%s5024_s13 + $0x50] sm:$0xff] }
 0x7f4   :  { %2299 = vmatprep.subr.mxu1 %v2237_v34  ;;  %v4816_v34 = vld [vmem:[%s5024_s13 + $0xc8] sm:$0xff] }
 0x7f5   :  { %2300 = vmatpush2.msra.mxu1 %v2236_v39  ;;  %v4822_v39 = vld [vmem:[%s5024_s13 + $0x48] sm:$0xff] }
 0x7f6   :  { %2301 = vmatprep.subr.mxu1 %v2235_v32  ;;  %v4828_v32 = vld [vmem:[%s5024_s13 + $0xc0] sm:$0xff] }
 0x7f7   :  { %2302 = vmatpush2.msra.mxu1 %v2234_v40  ;;  %v4834_v40 = vld [vmem:[%s5024_s13 + $0x40] sm:$0xff] }
 0x7f8   :  { %2303 = vmatprep.subr.mxu1 %v2233_v24  ;;  %v4840_v24 = vld [vmem:[%s5024_s13 + $0xb8] sm:$0xff] }
 0x7f9   :  { %2304 = vmatpush2.msra.mxu1 %v2232_v41  ;;  %v4846_v41 = vld [vmem:[%s5024_s13 + $0x38] sm:$0xff] }
 0x7fa   :  { %2305 = vmatprep.subr.mxu1 %v2231_v42  ;;  %v4852_v42 = vld [vmem:[%s5024_s13 + $0xb0] sm:$0xff] }
 0x7fb   :  { %2306 = vmatpush2.msra.mxu1 %v2230_v15  ;;  %v4858_v15 = vld [vmem:[%s5024_s13 + $0x30] sm:$0xff] }
 0x7fc   :  { %2307 = vmatprep.subr.mxu1 %v2229_v17  ;;  %v4864_v17 = vld [vmem:[%s5024_s13 + $0xa8] sm:$0xff] }
 0x7fd   :  { %2308 = vmatpush2.msra.mxu1 %v2228_v19  ;;  %v4870_v19 = vld [vmem:[%s5024_s13 + $0x28] sm:$0xff] }
 0x7fe   :  { %2309 = vmatprep.subr.mxu1 %v2227_v21  ;;  %v4876_v21 = vld [vmem:[%s5024_s13 + $0xa0] sm:$0xff] }
 0x7ff   :  { %2310 = vmatpush2.msra.mxu1 %v2226_v23  ;;  %v4882_v23 = vld [vmem:[%s5024_s13 + $0x20] sm:$0xff] }
 0x800   :  { %2311 = vmatprep.subr.mxu1 %v2225_v25  ;;  %v4888_v25 = vld [vmem:[%s5024_s13 + $0x98] sm:$0xff] }
 0x801   :  { %2312 = vmatpush2.msra.mxu1 %v2224_v27  ;;  %v4894_v27 = vld [vmem:[%s5024_s13 + $0x18] sm:$0xff] }
 0x802   :  { %2313 = vmatprep.subr.mxu1 %v2223_v29  ;;  %v4900_v29 = vld [vmem:[%s5024_s13 + $0x90] sm:$0xff] }
 0x803   :  { %2314 = vmatpush2.msra.mxu1 %v2222_v43  ;;  %v4905_v43 = vld [vmem:[%s5024_s13 + $0x10] sm:$0xff] }
 0x804   :  { %2315 = vmatprep.subr.mxu1 %v2221_v44  ;;  %v4910_v44 = vld [vmem:[%s5024_s13 + $0x88] sm:$0xff] }
 0x805   :  { %2316 = vmatpush2.msra.mxu1 %v2220_v45  ;;  %v4916_v45 = vld [vmem:[%s5024_s13 + $0x8] sm:$0xff] }
 0x806   :  { %2317 = vmatprep.subr.mxu1 %v2219_v20  ;;  %v4922_v20 = vld [vmem:[%s5024_s13 + $0x80] sm:$0xff] }
 0x807   :  { %2318 = vmatpush2.msra.mxu1 %v2218_v47  ;;  %v4928_v47 = vld [vmem:[%s5024_s13] sm:$0xff] }
 0x808   :  { %2319 = vmatprep.subr.mxu1 %v2217_v48  ;;  %v2246_v48 = vld [vmem:[%s5021_s10] sm:$0x3] }
 0x809   :  { %2320 = vmatpush2.msra.mxu1 %v2216_v49  ;;  %v2251_v49 = vrot.slane %v2246_v48, %v3865_v12 }
 0x80a   :  { %2321 = vmatprep.subr.mxu1 %v2215_v5  ;;  %v2255_v5 = vrot.slane %v2246_v48, %v3869_v14 }
 0x80b   :  { %2322 = vmatpush2.msra.mxu1 %v2214_v50 }
 0x80c   :  { %2323 = vmatprep.subr.mxu1 %v2213_v51 }
 0x80d   :  { %2324 = vmatpush2.msra.mxu1 %v2212_v53 }
 0x88a   :  { %v2068_v57 = vpop.f32.mrf.mxu1 }
 0x88b   :  { %v2146_v58 = vrot.slane %v2068_v57, %v3865_v12 }
 0x88c   :  { %v2070_v60 = vpop.f32.mrf.mxu1 }
 0x88d   :  { %v2155_v61 = vmul.f32 %v2146_v58, %v4495_v62  ;;  %v2150_v63 = vrot.slane %v2070_v60, %v3865_v12 }
 0x88e   :  { %v2139_v1 = vpop.f32.mrf.mxu1 }
 0x88f   :  { %v2156_v35 = vmul.f32 %v2150_v63, %v4501_v13  ;;  %v2154_v36 = vrot.slane %v2139_v1, %v3865_v12  ;;  %v2174_v7 = vadd.f32 %v2162_v59, %v2155_v61  ;;  %v4759_v13 = vld [vmem:[%s5024_s13 + $0x70] sm:$0xff] }
 0x890   :  { %v3212_v8 = vpop.f32.mrf.mxu1 }
 0x891   :  { %v2157_v9 = vmul.f32 %v2154_v36, %v4508_v31  ;;  %v2175_v22 = vadd.f32 %v2166_v0, %v2156_v35  ;;  %v2177_v26 = vmax.f32 %v2174_v7, 0.0  ;;  %v4766_v31 = vld [vmem:[%s5024_s13 + $0xe8] sm:$0xff] }
 0x893   :  { %v2176_v18 = vadd.f32 %v2170_v3, %v2157_v9  ;;  %v2178_v46 = vmax.f32 %v2175_v22, 0.0 }
 0x895   :  { %v2179_v62 = vmax.f32 %v2176_v18, 0.0  ;;  %2325 = vmatprep.mubr.f32.mxu1 %v2178_v46  ;;  %v2435_v46 = vld [vmem:[%s5025_s14] sm:$0xff] }
 0x896   :  { %2326 = vmatmul.mubr.f32.vlgmr.msra.gmra.mxu1 %v2177_v26  ;;  %v2524_v26 = vcombine.high %v2435_v46, %v2435_v46 }
 0x897   :  { %2862 = vmatmul.mubr.msk.f32.vlgmr.msra.gmra.mxu0 %vm1515_vm6, %v2179_v62  ;;  %2770 = vmatprep.mubr.f32.mxu1 %v5029_v16 }
 0x898   :  { %3099 = vmatpush3.msra.mxu0 %v4748_v28  ;;  %2866 = vmatprep.subr.msk.mxu1 %vm381_vm3, %v2524_v26 }
 0x899   :  { %3100 = vmatprep.subr.mxu0 %v4753_v6  ;;  %2867 = vmatpush1.msk.msra.mxu1 %vm381_vm3, %v2435_v46 }
 0x89a   :  { %3101 = vmatpush3.msra.mxu0 %v4759_v13 }
 0x89b   :  { %3102 = vmatprep.subr.mxu0 %v4766_v31 }
 0x89c   :  { %3103 = vmatpush3.msra.mxu0 %v4772_v30 }
 0x89d   :  { %3104 = vmatprep.subr.mxu0 %v4778_v33 }
 0x89e   :  { %3105 = vmatpush3.msra.mxu0 %v4784_v4 }
 0x89f   :  { %3106 = vmatprep.subr.mxu0 %v4790_v11 }
 0x8a0   :  { %3107 = vmatpush3.msra.mxu0 %v4796_v37 }
 0x8a1   :  { %3108 = vmatprep.subr.mxu0 %v4802_v38 }
 0x8a2   :  { %3109 = vmatpush3.msra.mxu0 %v4810_v2 }
 0x8a3   :  { %3110 = vmatprep.subr.mxu0 %v4816_v34 }
 0x8a4   :  { %3111 = vmatpush3.msra.mxu0 %v4822_v39 }
 0x8a5   :  { %3112 = vmatprep.subr.mxu0 %v4828_v32 }
 0x8a6   :  { %3113 = vmatpush3.msra.mxu0 %v4834_v40 }
 0x8a7   :  { %3114 = vmatprep.subr.mxu0 %v4840_v24 }
 0x8a8   :  { %3115 = vmatpush3.msra.mxu0 %v4846_v41 }
 0x8a9   :  { %3116 = vmatprep.subr.mxu0 %v4852_v42 }
 0x8aa   :  { %3117 = vmatpush3.msra.mxu0 %v4858_v15 }
 0x8ab   :  { %3118 = vmatprep.subr.mxu0 %v4864_v17 }
 0x8ac   :  { %3119 = vmatpush3.msra.mxu0 %v4870_v19 }
 0x8ad   :  { %3120 = vmatprep.subr.mxu0 %v4876_v21 }
 0x8ae   :  { %3121 = vmatpush3.msra.mxu0 %v4882_v23 }
 0x8af   :  { %3122 = vmatprep.subr.mxu0 %v4888_v25 }
 0x8b0   :  { %3123 = vmatpush3.msra.mxu0 %v4894_v27 }
 0x8b1   :  { %3124 = vmatprep.subr.mxu0 %v4900_v29 }
 0x8b2   :  { %3125 = vmatpush3.msra.mxu0 %v4905_v43 }
 0x8b3   :  { %3126 = vmatprep.subr.mxu0 %v4910_v44 }
 0x8b4   :  { %3127 = vmatpush3.msra.mxu0 %v4916_v45 }
 0x8b5   :  { %3128 = vmatprep.subr.mxu0 %v4922_v20 }
 0x8b6   :  { %3129 = vmatpush3.msra.mxu0 %v4928_v47 }
 0x8b7   :  { %2863 = vmatprep.subr.msk.mxu0 %vm381_vm3, %v2524_v26 }
 0x956   :  { %v2327_v50 = vpop.f32.mrf.mxu1 }
 0x957   :  { %v2328_v51 = vadd.f32 %v2327_v50, %v2251_v49  ;;  %v2398_v52 = vpop.f32.mrf.mxu0 }
 0x958   :  { %v2329_v53 = vpop.f32.mrf.mxu1 }
 0x959   :  { %v4938_v54 = vadd.f32 %v2398_v52, %v2328_v51  ;;  %v2330_v56 = vadd.f32 %v2329_v53, %v2255_v5  ;;  %v2400_v57 = vpop.f32.mrf.mxu0 }
 0x95b   :  { %v2438_v58 = vsel %vm354_vm2, %v4938_v54, 0.0  ;;  %v4942_v59 = vadd.f32 %v2400_v57, %v2330_v56 }
 0x95c   :  { %v2439_v60 = vrot.slane %v2438_v58, 4 }
 0x95d   :  { %v2445_v61 = vsel %vm354_vm2, %v4942_v59, 0.0 }
 0x95e   :  { %v2440_v63 = vadd.f32 %v2439_v60, %v2438_v58  ;;  %v2446_v0 = vrot.slane %v2445_v61, 4 }
 0x960   :  { %v2441_v1 = vrot.slane %v2440_v63, 2  ;;  %v2447_v35 = vadd.f32 %v2446_v0, %v2445_v61 }
 0x962   :  { %v2442_v36 = vadd.f32 %v2441_v1, %v2440_v63  ;;  %v2448_v3 = vrot.slane %v2447_v35, 2 }
 0x964   :  { %v2449_v7 = vadd.f32 %v2448_v3, %v2447_v35  ;;  %v2443_v8 = vrot.slane %v2442_v36, 1 }
 0x966   :  { %v2450_v9 = vrot.slane %v2449_v7, 1  ;;  %v2444_v18 = vadd.f32 %v2443_v8, %v2442_v36 }
 0x968   :  { %v2451_v22 = vadd.f32 %v2450_v9, %v2449_v7 }
 0x96a   :  { %2516 = vmatprep.mubr.f32.mxu0 %v2451_v22 }
 0x96b   :  { %2517 = vmatmul.mubr.f32.vlgmr.msra.gmra.mxu0 %v2444_v18 }
 0x96c   :  { %2596 = vmatprep.mubr.f32.mxu0 %v5029_v16  ;;  %2864 = vmatpush1.msk.msra.mxu0 %vm381_vm3, %v2435_v46 }
 0x96d   :  { %3133 = vmatprep.subr.mxu0 %v4730_v55 }
 0xa2b   :  { %v3130_v62 = vpop.f32.mrf.mxu0 }
 0xa2d   :  { %v3131_v48 = vpop.f32.mrf.mxu0 }
 0xa2e   :  { %v3132_v49 = vadd.f32 %v3131_v48, %v3130_v62 }
 0xa30   :  { %v2522_v5 = vmul.f32 0.0078125, %v3132_v49 }
 0xa32   :  { %2865 = vmatmul.mubr.msk.f32.vlgmr.msra.gmra.mxu0 %vm377_vm4, %v2522_v5 }
 0xa33   :  { %3134 = vmatpush3.msra.mxu0 %v4748_v28 }
 0xa34   :  { %3135 = vmatprep.subr.mxu0 %v4753_v6 }
 0xa35   :  { %3136 = vmatpush3.msra.mxu0 %v4759_v13 }
 0xa36   :  { %3137 = vmatprep.subr.mxu0 %v4766_v31 }
 0xa37   :  { %3138 = vmatpush3.msra.mxu0 %v4772_v30 }
 0xa38   :  { %3139 = vmatprep.subr.mxu0 %v4778_v33 }
 0xa39   :  { %3140 = vmatpush3.msra.mxu0 %v4784_v4 }
 0xa3a   :  { %3141 = vmatprep.subr.mxu0 %v4790_v11 }
 0xa3b   :  { %3142 = vmatpush3.msra.mxu0 %v4796_v37 }
 0xa3c   :  { %3143 = vmatprep.subr.mxu0 %v4802_v38 }
 0xa3d   :  { %3144 = vmatpush3.msra.mxu0 %v4810_v2 }
 0xa3e   :  { %3145 = vmatprep.subr.mxu0 %v4816_v34 }
 0xa3f   :  { %3146 = vmatpush3.msra.mxu0 %v4822_v39 }
 0xa40   :  { %3147 = vmatprep.subr.mxu0 %v4828_v32 }
 0xa41   :  { %3148 = vmatpush3.msra.mxu0 %v4834_v40 }
 0xa42   :  { %3149 = vmatprep.subr.mxu0 %v4840_v24 }
 0xa43   :  { %3150 = vmatpush3.msra.mxu0 %v4846_v41 }
 0xa44   :  { %3151 = vmatprep.subr.mxu0 %v4852_v42 }
 0xa45   :  { %3152 = vmatpush3.msra.mxu0 %v4858_v15 }
 0xa46   :  { %3153 = vmatprep.subr.mxu0 %v4864_v17 }
 0xa47   :  { %3154 = vmatpush3.msra.mxu0 %v4870_v19 }
 0xa48   :  { %3155 = vmatprep.subr.mxu0 %v4876_v21 }
 0xa49   :  { %3156 = vmatpush3.msra.mxu0 %v4882_v23 }
 0xa4a   :  { %3157 = vmatprep.subr.mxu0 %v4888_v25 }
 0xa4b   :  { %3158 = vmatpush3.msra.mxu0 %v4894_v27 }
 0xa4c   :  { %3159 = vmatprep.subr.mxu0 %v4900_v29  ;;  %v2436_v29 = vld [vmem:[%s5022_s11] sm:$0x1] }
 0xa4d   :  { %3160 = vmatpush3.msra.mxu0 %v4905_v43 }
 0xa4e   :  { %3161 = vmatprep.subr.mxu0 %v4910_v44 }
 0xa4f   :  { %3162 = vmatpush3.msra.mxu0 %v4916_v45  ;;  %v2437_v45 = vld [vmem:[%s5023_s12] sm:$0x3]  ;;  %s3281_s12 = smov [#allocation2]  }
 0xa50   :  { %3163 = vmatprep.subr.mxu0 %v4922_v20  ;;  %v2791_v50 = vrot.slane %v2437_v45, %v3865_v12  ;;  %s2822_s30 = sshll.u32 %s3281_s12, 4  ;;  %s2823_s30 = int_to_ptr.vmem [resolvable:$true] %s2822_s30 }
 0xa51   :  { %3164 = vmatpush3.msra.mxu0 %v4928_v47  ;;  %s3257_s16 = scalar_lea.vmem %s2823_s30, 64  ;;  %p3262_p1 = scmp.lt.s32.totalorder %s2823_s30, %s2823_s30 }
 0xa52   :  { %p3258_p0 = scmp.ne.s32.totalorder %s2823_s30, %s3257_s16  ;;  %p3263_p2 = scmp.lt.s32.totalorder %s3257_s16, %s3257_s16 }
 0xa54   :  { %p3264_p3 = por %p3263_p2, %p3262_p1 }
 0xa56   :  { %p3265_p4 = pnand %p3264_p3, %p3258_p0 }
 0xaf2   :  { %v2598_v16 = vpop.f32.mrf.mxu0 }
 0xaf3   :  { %v2606_v55 = vrot.slane %v2598_v16, %v3865_v12 }
 0xaf4   :  { %v2600_v28 = vpop.f32.mrf.mxu0 }
 0xaf5   :  { %v2611_v6 = vsub.f32 %v4938_v54, %v2606_v55  ;;  %v2610_v13 = vrot.slane %v2600_v28, %v3865_v12  ;;  %v2795_v54 = vrot.slane %v2437_v45, %v3869_v14 }
 0xaf7   :  { %v2613_v31 = vmul.f32 %v2611_v6, %v2611_v6  ;;  %v2612_v30 = vsub.f32 %v4942_v59, %v2610_v13  ;;  %v3256_v59 = vld.sshfl [vmem:[%s5011_s0] sm:$0x33 pattern:$0x76325410] }
 0xaf9   :  { %v2615_v33 = vsel %vm354_vm2, %v2613_v31, 0.0  ;;  %v2614_v4 = vmul.f32 %v2612_v30, %v2612_v30 }
 0xafa   :  { %v2616_v11 = vrot.slane %v2615_v33, 4 }
 0xafb   :  { %v2622_v37 = vsel %vm354_vm2, %v2614_v4, 0.0 }
 0xafc   :  { %v2617_v38 = vadd.f32 %v2616_v11, %v2615_v33  ;;  %v2623_v2 = vrot.slane %v2622_v37, 4 }
 0xafe   :  { %v2618_v34 = vrot.slane %v2617_v38, 2  ;;  %v2624_v39 = vadd.f32 %v2623_v2, %v2622_v37 }
 0xb00   :  { %v2625_v32 = vrot.slane %v2624_v39, 2  ;;  %v2619_v40 = vadd.f32 %v2618_v34, %v2617_v38 }
 0xb02   :  { %v2626_v24 = vadd.f32 %v2625_v32, %v2624_v39  ;;  %v2620_v41 = vrot.slane %v2619_v40, 1 }
 0xb04   :  { %v2627_v42 = vrot.slane %v2626_v24, 1  ;;  %v2621_v17 = vadd.f32 %v2620_v41, %v2619_v40 }
 0xb06   :  { %v2628_v15 = vadd.f32 %v2627_v42, %v2626_v24 }
 0xb08   :  { %2693 = vmatprep.mubr.f32.mxu0 %v2628_v15 }
 0xb09   :  { %2694 = vmatmul.mubr.f32.vlgmr.msra.gmra.mxu0 %v2621_v17 }
 0xbc9   :  { %v3165_v19 = vpop.f32.mrf.mxu0 }
 0xbcb   :  { %v3166_v21 = vpop.f32.mrf.mxu0 }
 0xbcc   :  { %v3167_v23 = vadd.f32 %v3166_v21, %v3165_v19 }
 0xbce   :  { %v2699_v25 = vmul.f32 0.0078125, %v3167_v23 }
 0xbd0   :  { %v2700_v27 = vadd.f32 1e-05, %v2699_v25 }
 0xbd2   :  { %3222 = vrsqrt.f32 %v2700_v27 }
 0xbdf   :  { %v3223_v43 = vpop.eup %3222 }
 0xbe0   :  { %v2702_v44 = vmul.f32 %v3223_v43, %v2436_v29 }
 0xbe2   :  { %2868 = vmatmul.mubr.msk.f32.vlgmr.msra.gmra.mxu1 %vm377_vm4, %v2702_v44 }
 0xca2   :  { %v2772_v20 = vpop.f32.mrf.mxu1 }
 0xca3   :  { %v2780_v47 = vrot.slane %v2772_v20, %v3865_v12 }
 0xca4   :  { %v2774_v51 = vpop.f32.mrf.mxu1 }
 0xca5   :  { %v2785_v52 = vmul.f32 %v2780_v47, %v2611_v6  ;;  %v2784_v53 = vrot.slane %v2774_v51, %v3865_v12 }
 0xca7   :  { %v2798_v56 = vadd.f32 %v2791_v50, %v2785_v52  ;;  %v2786_v57 = vmul.f32 %v2784_v53, %v2612_v30 }
 0xca9   :  { %v2799_v58 = vadd.f32 %v2795_v54, %v2786_v57  ;;  %v2800_v60 = vadd.f32 %v3256_v59, %v2798_v56 }
 0xcab   :  { %v2801_v61 = vadd.f32 %v2799_v58, %v3588_v10  ;;  %v2802_v63 = vmax.f32 %v2800_v60, 0.0 }
 0xcad   :  { %v2803_v0 = vmax.f32 %v2801_v61, 0.0 }
 0xcaf   :  { %v2806_v1 = vcombine.low %v2802_v63, %v2803_v0 }
 0xcb1   :  { %2869 = vst.sshfl [vmem:[#allocation2] sm:$0x33 pattern:$0x76325410] %v2806_v1 }
 0xcb2   :  { %3268 = shalt.err (!%p3265_p4)
}
 0xcb3   :  { %2825 = dma.vmem_to_hbm [thread:$0]  %s2823_s30, 64, %s5026_s15, [#allocation3]  }
 0xcb4   :  { %3277 = dma.done.wait [#allocation3], 64  }
 0xcb5   :  { %3278 = vsyncadd [#allocation3], 4294967232 }
 0xcb6   :  { %2829 = vsyncpa [#allocation3], 1 }

</bundles_post_ra>
